<compile_context>
chip_gen: v6e
topology: v6e:2x2x1
jax: 0.10.0
libtpu: 0.0.40
codegen_flags: <defaults>
</compile_context>

<pallas_src>
import numpy as np
import jax
import jax.numpy as jnp
from jax.experimental import pallas as pl
from jax.experimental.pallas import tpu as pltpu

# ---- fixed model dimensions (implied by the PyTorch module) -------------------
C_IN, C_OUT = 3, 18
H, W = 32, 32
PH, PW = H // 2, W // 2            # pooled spatial: 16, 16
NPIX = PH * PW                     # 256 pooled pixels
K_CONV = C_IN * 9                  # 27 im2col rows
FC1_IN = C_OUT * NPIX              # 18 * 16 * 16 = 4608
FC1_OUT = 64
FC2_OUT = 10
LOGIT_PAD = 128                    # lane-dense padded logits width


# ---- fused kernel: conv + relu + pool + fc1 + relu + fc2 ----------------------
def fused_forward_kernel(p_ref, wc_ref, bc_ref, w1_ref, b1_ref, w2_ref, b2_ref,
                         out_ref):
    # p_ref : (1, 27, 1024)  im2col patches; column index = d*256 + ph*16 + pw
    # wc_ref: (18, 27)       conv weights, row=o, col=(kh,kw,c)
    # bc_ref: (18, 1)        conv bias
    # w1_ref: (18, 256, 64)  fc1 weights split per conv channel
    # b1_ref: (1, 64)        fc1 bias
    # w2_ref: (64, 128)      fc2 weights, zero-padded 10 -> 128
    # b2_ref: (1, 128)       fc2 bias, zero-padded
    # out_ref: (1, 1, 128)
    patches = p_ref[0]                                                  # (27, 1024)

    # conv as a single MXU matmul, channel-major output
    conv = jnp.dot(wc_ref[...], patches,
                   preferred_element_type=jnp.float32)                 # (18, 1024)

    # maxpool 2x2: the 4 pooling offsets are 4 contiguous 256-lane chunks
    m = jnp.maximum(
        jnp.maximum(conv[:, 0 * NPIX:1 * NPIX], conv[:, 1 * NPIX:2 * NPIX]),
        jnp.maximum(conv[:, 2 * NPIX:3 * NPIX], conv[:, 3 * NPIX:4 * NPIX]))
    pooled = jnp.maximum(m + bc_ref[...], 0.0)                          # (18, 256)

    # fc1 (4608 -> 64): accumulate K in 18 channel chunks of 256
    # (keeps everything layout-native; no in-kernel flatten/reshape needed)
    acc = jnp.zeros((1, FC1_OUT), jnp.float32)
    for c in range(C_OUT):
        acc = acc + jnp.dot(pooled[c:c + 1, :], w1_ref[c],
                            preferred_element_type=jnp.float32)
    h = jnp.maximum(acc + b1_ref[...], 0.0)                             # (1, 64)

    # fc2 (64 -> 10, zero-padded to 128 lanes for an unmasked store)
    out_ref[0] = jnp.dot(h, w2_ref[...],
                         preferred_element_type=jnp.float32) + b2_ref[...]


# ---- one-time weight repacking (kept OUT of the forward pass) -----------------
def prepare_params(params):
    w_conv, b_conv, w_fc1, b_fc1, w_fc2, b_fc2 = params
    # conv (O, I, 3, 3) -> (O, kh, kw, c) -> (18, 27); row order matches im2col rows
    w_cm = jnp.transpose(w_conv, (0, 2, 3, 1)).reshape(C_OUT, K_CONV).astype(jnp.float32)
    bc = b_conv.reshape(C_OUT, 1).astype(jnp.float32)
    # fc1 (64, 4608) with input order (c, ph, pw) -> (18, 256, 64)
    w1r = jnp.transpose(w_fc1.reshape(FC1_OUT, C_OUT, NPIX), (1, 2, 0)).astype(jnp.float32)
    b1 = b_fc1.reshape(1, FC1_OUT).astype(jnp.float32)
    # fc2 (10, 64) -> (64, 128) zero-padded on the logits dim
    w2p = jnp.zeros((FC1_OUT, LOGIT_PAD), jnp.float32).at[:, :FC2_OUT].set(w_fc2.T)
    b2p = jnp.zeros((1, LOGIT_PAD), jnp.float32).at[:, :FC2_OUT].set(b_fc2)
    return (w_cm, bc, w1r, b1, w2p, b2p)


# ---- host-side glue: im2col with pooling-offset-major column order ------------
def _im2col_pool_major(x_nchw):
    B = x_nchw.shape[0]
    x = jnp.transpose(x_nchw, (0, 2, 3, 1)).astype(jnp.float32)         # (B, 32, 32, 3)
    xp = jnp.pad(x, ((0, 0), (1, 1), (1, 1), (0, 0)))                   # (B, 34, 34, 3)
    shifted = jnp.stack([xp[:, kh:kh + H, kw:kw + W, :]
                         for kh in range(3) for kw in range(3)], axis=1)  # (B,9,32,32,3)
    shifted = shifted.reshape(B, 9, PH, 2, PW, 2, C_IN)                  # (b,k9,ph,dh,pw,dw,c)
    patches = jnp.transpose(shifted, (0, 1, 6, 3, 5, 2, 4))              # (b,k9,c,dh,dw,ph,pw)
    return patches.reshape(B, K_CONV, 4 * NPIX)                          # (B, 27, 1024)


@jax.jit
def simple_conv_net_forward(x_nchw, prepared):
    w_cm, bc, w1r, b1, w2p, b2p = prepared
    B = x_nchw.shape[0]
    patches = _im2col_pool_major(x_nchw)

    out = pl.pallas_call(
        fused_forward_kernel,
        out_shape=jax.ShapeDtypeStruct((B, 1, LOGIT_PAD), jnp.float32),
        grid=(B,),
        in_specs=[
            pl.BlockSpec((1, K_CONV, 4 * NPIX), lambda b: (b, 0, 0)),    # per-image patches
            pl.BlockSpec((C_OUT, K_CONV), lambda b: (0, 0)),             # weights: constant
            pl.BlockSpec((C_OUT, 1), lambda b: (0, 0)),                  # index maps keep
            pl.BlockSpec((C_OUT, NPIX, FC1_OUT), lambda b: (0, 0, 0)),   # them VMEM-resident
            pl.BlockSpec((1, FC1_OUT), lambda b: (0, 0)),
            pl.BlockSpec((FC1_OUT, LOGIT_PAD), lambda b: (0, 0)),
            pl.BlockSpec((1, LOGIT_PAD), lambda b: (0, 0)),
        ],
        out_specs=pl.BlockSpec((1, 1, LOGIT_PAD), lambda b: (b, 0, 0)),
        compiler_params=pltpu.CompilerParams(dimension_semantics=("parallel",)),
    )(patches, w_cm, bc, w1r, b1, w2p, b2p)

    return out[:, 0, :FC2_OUT]                                           # (B, 10)


# ---- pure-JAX reference (for a correctness check) -----------------------------
def reference_forward(x_nchw, params):
    w_conv, b_conv, w_fc1, b_fc1, w_fc2, b_fc2 = params
    B = x_nchw.shape[0]
    conv = jax.lax.conv_general_dilated(
        x_nchw, w_conv, window_strides=(1, 1), padding=((1, 1), (1, 1)),
        dimension_numbers=("NCHW", "OIHW", "NCHW"),
        precision=jax.lax.Precision.HIGHEST)
    conv = jnp.maximum(conv + b_conv.reshape(1, C_OUT, 1, 1), 0.0)
    pooled = jax.lax.reduce_window(conv, -jnp.inf, jax.lax.max,
                                   (1, 1, 2, 2), (1, 1, 2, 2), "VALID")
    feat = pooled.reshape(B, FC1_IN)
    h = jnp.maximum(feat @ w_fc1.T + b_fc1, 0.0)
    return h @ w_fc2.T + b_fc2


# ---- deterministic parameter init (shapes from the module __init__) -----------
def init_params(key):
    ks = jax.random.split(key, 6)
    w_conv = jax.random.normal(ks[0], (C_OUT, C_IN, 3, 3), jnp.float32) * (1.0 / np.sqrt(C_IN * 9))
    b_conv = jax.random.normal(ks[1], (C_OUT,), jnp.float32) * 0.05
    w_fc1 = jax.random.normal(ks[2], (FC1_OUT, FC1_IN), jnp.float32) * (1.0 / np.sqrt(FC1_IN))
    b_fc1 = jax.random.normal(ks[3], (FC1_OUT,), jnp.float32) * 0.05
    w_fc2 = jax.random.normal(ks[4], (FC2_OUT, FC1_OUT), jnp.float32) * (1.0 / np.sqrt(FC1_OUT))
    b_fc2 = jax.random.normal(ks[5], (FC2_OUT,), jnp.float32) * 0.05
    return (w_conv, b_conv, w_fc1, b_fc1, w_fc2, b_fc2)


if __name__ == "__main__":
    key = jax.random.PRNGKey(0)
    k_x, k_p = jax.random.split(key)
    params = init_params(k_p)
    x = jax.random.normal(k_x, (2, C_IN, H, W), jnp.float32)   # (batch=2, 3, 32, 32)

    prepared = prepare_params(params)                          # one-time weight repack
    logits = jax.block_until_ready(simple_conv_net_forward(x, prepared))

    ref = jax.block_until_ready(reference_forward(x, params))
    np.testing.assert_allclose(np.asarray(logits), np.asarray(ref), rtol=2e-2, atol=2e-2)

    assert logits.shape == (2, FC2_OUT)
    print("KERNEL_OK")
</pallas_src>

<mosaic_0001>
module attributes {stable_mosaic.version = 11 : i64} {
  func.func @fused_forward_kernel(%arg0: i32, %arg1: memref<1x27x1024xf32, #tpu.memory_space<vmem>>, %arg2: memref<18x27xf32, #tpu.memory_space<vmem>>, %arg3: memref<18x1xf32, #tpu.memory_space<vmem>>, %arg4: memref<18x256x64xf32, #tpu.memory_space<vmem>>, %arg5: memref<1x64xf32, #tpu.memory_space<vmem>>, %arg6: memref<64x128xf32, #tpu.memory_space<vmem>>, %arg7: memref<1x128xf32, #tpu.memory_space<vmem>>, %arg8: memref<1x1x128xf32, #tpu.memory_space<vmem>>) attributes {dimension_semantics = [#tpu.dimension_semantics<parallel>], iteration_bounds = array<i64: 2>, scalar_prefetch = 0 : i64, scratch_operands = 0 : i64, tpu.core_type = #tpu.core_type<tc>, window_params = [{transform_indices = @transform_0, window_bounds = array<i64: 1, 27, 1024>}, {pipeline_mode = #tpu.pipeline_mode<synchronous>, transform_indices = @transform_1, window_bounds = array<i64: 18, 27>}, {pipeline_mode = #tpu.pipeline_mode<synchronous>, transform_indices = @transform_2, window_bounds = array<i64: 18, 1>}, {pipeline_mode = #tpu.pipeline_mode<synchronous>, transform_indices = @transform_3, window_bounds = array<i64: 18, 256, 64>}, {pipeline_mode = #tpu.pipeline_mode<synchronous>, transform_indices = @transform_4, window_bounds = array<i64: 1, 64>}, {pipeline_mode = #tpu.pipeline_mode<synchronous>, transform_indices = @transform_5, window_bounds = array<i64: 64, 128>}, {pipeline_mode = #tpu.pipeline_mode<synchronous>, transform_indices = @transform_6, window_bounds = array<i64: 1, 128>}, {transform_indices = @transform_7, window_bounds = array<i64: 1, 1, 128>}]} {
    %c0 = arith.constant 0 : index
    %c0_0 = arith.constant 0 : index
    %c0_1 = arith.constant 0 : index
    %0 = vector.load %arg1[%c0, %c0_0, %c0_1] : memref<1x27x1024xf32, #tpu.memory_space<vmem>>, vector<1x27x1024xf32>
    %1 = vector.shape_cast %0 : vector<1x27x1024xf32> to vector<27x1024xf32>
    %c0_2 = arith.constant 0 : index
    %c0_3 = arith.constant 0 : index
    %2 = vector.load %arg2[%c0_2, %c0_3] : memref<18x27xf32, #tpu.memory_space<vmem>>, vector<18x27xf32>
    %cst = arith.constant dense<0.000000e+00> : vector<18x1024xf32>
    %3 = tpu.matmul %2, %1, %cst {dimension_numbers = #tpu.dot_dimension_numbers<[1], [0], [0], [1], [0, 0, 1, 1], [], []>} : vector<18x27xf32>, vector<27x1024xf32>, vector<18x1024xf32> -> vector<18x1024xf32>
    %4 = vector.extract_strided_slice %3 {offsets = [0, 0], sizes = [18, 256], strides = [1, 1]} : vector<18x1024xf32> to vector<18x256xf32>
    %5 = vector.extract_strided_slice %3 {offsets = [0, 256], sizes = [18, 256], strides = [1, 1]} : vector<18x1024xf32> to vector<18x256xf32>
    %6 = arith.maximumf %4, %5 : vector<18x256xf32>
    %7 = vector.extract_strided_slice %3 {offsets = [0, 512], sizes = [18, 256], strides = [1, 1]} : vector<18x1024xf32> to vector<18x256xf32>
    %8 = vector.extract_strided_slice %3 {offsets = [0, 768], sizes = [18, 256], strides = [1, 1]} : vector<18x1024xf32> to vector<18x256xf32>
    %9 = arith.maximumf %7, %8 : vector<18x256xf32>
    %10 = arith.maximumf %6, %9 : vector<18x256xf32>
    %c0_4 = arith.constant 0 : index
    %c0_5 = arith.constant 0 : index
    %11 = vector.load %arg3[%c0_4, %c0_5] : memref<18x1xf32, #tpu.memory_space<vmem>>, vector<18x1xf32>
    %12 = vector.broadcast %11 : vector<18x1xf32> to vector<18x256xf32>
    %13 = arith.addf %10, %12 : vector<18x256xf32>
    %cst_6 = arith.constant 0.000000e+00 : f32
    %14 = vector.broadcast %cst_6 : f32 to vector<18x256xf32>
    %15 = arith.maximumf %13, %14 : vector<18x256xf32>
    %cst_7 = arith.constant 0.000000e+00 : f32
    %16 = vector.broadcast %cst_7 : f32 to vector<1x64xf32>
    %17 = vector.extract_strided_slice %15 {offsets = [0, 0], sizes = [1, 256], strides = [1, 1]} : vector<18x256xf32> to vector<1x256xf32>
    %c0_8 = arith.constant 0 : index
    %c0_9 = arith.constant 0 : index
    %c0_10 = arith.constant 0 : index
    %18 = vector.load %arg4[%c0_8, %c0_9, %c0_10] : memref<18x256x64xf32, #tpu.memory_space<vmem>>, vector<1x256x64xf32>
    %19 = vector.shape_cast %18 : vector<1x256x64xf32> to vector<256x64xf32>
    %cst_11 = arith.constant dense<0.000000e+00> : vector<1x64xf32>
    %20 = tpu.matmul %17, %19, %cst_11 {dimension_numbers = #tpu.dot_dimension_numbers<[1], [0], [0], [1], [0, 0, 1, 1], [], []>} : vector<1x256xf32>, vector<256x64xf32>, vector<1x64xf32> -> vector<1x64xf32>
    %21 = arith.addf %16, %20 : vector<1x64xf32>
    %22 = vector.extract_strided_slice %15 {offsets = [1, 0], sizes = [1, 256], strides = [1, 1]} : vector<18x256xf32> to vector<1x256xf32>
    %c1 = arith.constant 1 : index
    %c0_12 = arith.constant 0 : index
    %c0_13 = arith.constant 0 : index
    %23 = vector.load %arg4[%c1, %c0_12, %c0_13] : memref<18x256x64xf32, #tpu.memory_space<vmem>>, vector<1x256x64xf32>
    %24 = vector.shape_cast %23 : vector<1x256x64xf32> to vector<256x64xf32>
    %cst_14 = arith.constant dense<0.000000e+00> : vector<1x64xf32>
    %25 = tpu.matmul %22, %24, %cst_14 {dimension_numbers = #tpu.dot_dimension_numbers<[1], [0], [0], [1], [0, 0, 1, 1], [], []>} : vector<1x256xf32>, vector<256x64xf32>, vector<1x64xf32> -> vector<1x64xf32>
    %26 = arith.addf %21, %25 : vector<1x64xf32>
    %27 = vector.extract_strided_slice %15 {offsets = [2, 0], sizes = [1, 256], strides = [1, 1]} : vector<18x256xf32> to vector<1x256xf32>
    %c2 = arith.constant 2 : index
    %c0_15 = arith.constant 0 : index
    %c0_16 = arith.constant 0 : index
    %28 = vector.load %arg4[%c2, %c0_15, %c0_16] : memref<18x256x64xf32, #tpu.memory_space<vmem>>, vector<1x256x64xf32>
    %29 = vector.shape_cast %28 : vector<1x256x64xf32> to vector<256x64xf32>
    %cst_17 = arith.constant dense<0.000000e+00> : vector<1x64xf32>
    %30 = tpu.matmul %27, %29, %cst_17 {dimension_numbers = #tpu.dot_dimension_numbers<[1], [0], [0], [1], [0, 0, 1, 1], [], []>} : vector<1x256xf32>, vector<256x64xf32>, vector<1x64xf32> -> vector<1x64xf32>
    %31 = arith.addf %26, %30 : vector<1x64xf32>
    %32 = vector.extract_strided_slice %15 {offsets = [3, 0], sizes = [1, 256], strides = [1, 1]} : vector<18x256xf32> to vector<1x256xf32>
    %c3 = arith.constant 3 : index
    %c0_18 = arith.constant 0 : index
    %c0_19 = arith.constant 0 : index
    %33 = vector.load %arg4[%c3, %c0_18, %c0_19] : memref<18x256x64xf32, #tpu.memory_space<vmem>>, vector<1x256x64xf32>
    %34 = vector.shape_cast %33 : vector<1x256x64xf32> to vector<256x64xf32>
    %cst_20 = arith.constant dense<0.000000e+00> : vector<1x64xf32>
    %35 = tpu.matmul %32, %34, %cst_20 {dimension_numbers = #tpu.dot_dimension_numbers<[1], [0], [0], [1], [0, 0, 1, 1], [], []>} : vector<1x256xf32>, vector<256x64xf32>, vector<1x64xf32> -> vector<1x64xf32>
    %36 = arith.addf %31, %35 : vector<1x64xf32>
    %37 = vector.extract_strided_slice %15 {offsets = [4, 0], sizes = [1, 256], strides = [1, 1]} : vector<18x256xf32> to vector<1x256xf32>
    %c4 = arith.constant 4 : index
    %c0_21 = arith.constant 0 : index
    %c0_22 = arith.constant 0 : index
    %38 = vector.load %arg4[%c4, %c0_21, %c0_22] : memref<18x256x64xf32, #tpu.memory_space<vmem>>, vector<1x256x64xf32>
    %39 = vector.shape_cast %38 : vector<1x256x64xf32> to vector<256x64xf32>
    %cst_23 = arith.constant dense<0.000000e+00> : vector<1x64xf32>
    %40 = tpu.matmul %37, %39, %cst_23 {dimension_numbers = #tpu.dot_dimension_numbers<[1], [0], [0], [1], [0, 0, 1, 1], [], []>} : vector<1x256xf32>, vector<256x64xf32>, vector<1x64xf32> -> vector<1x64xf32>
    %41 = arith.addf %36, %40 : vector<1x64xf32>
    %42 = vector.extract_strided_slice %15 {offsets = [5, 0], sizes = [1, 256], strides = [1, 1]} : vector<18x256xf32> to vector<1x256xf32>
    %c5 = arith.constant 5 : index
    %c0_24 = arith.constant 0 : index
    %c0_25 = arith.constant 0 : index
    %43 = vector.load %arg4[%c5, %c0_24, %c0_25] : memref<18x256x64xf32, #tpu.memory_space<vmem>>, vector<1x256x64xf32>
    %44 = vector.shape_cast %43 : vector<1x256x64xf32> to vector<256x64xf32>
    %cst_26 = arith.constant dense<0.000000e+00> : vector<1x64xf32>
    %45 = tpu.matmul %42, %44, %cst_26 {dimension_numbers = #tpu.dot_dimension_numbers<[1], [0], [0], [1], [0, 0, 1, 1], [], []>} : vector<1x256xf32>, vector<256x64xf32>, vector<1x64xf32> -> vector<1x64xf32>
    %46 = arith.addf %41, %45 : vector<1x64xf32>
    %47 = vector.extract_strided_slice %15 {offsets = [6, 0], sizes = [1, 256], strides = [1, 1]} : vector<18x256xf32> to vector<1x256xf32>
    %c6 = arith.constant 6 : index
    %c0_27 = arith.constant 0 : index
    %c0_28 = arith.constant 0 : index
    %48 = vector.load %arg4[%c6, %c0_27, %c0_28] : memref<18x256x64xf32, #tpu.memory_space<vmem>>, vector<1x256x64xf32>
    %49 = vector.shape_cast %48 : vector<1x256x64xf32> to vector<256x64xf32>
    %cst_29 = arith.constant dense<0.000000e+00> : vector<1x64xf32>
    %50 = tpu.matmul %47, %49, %cst_29 {dimension_numbers = #tpu.dot_dimension_numbers<[1], [0], [0], [1], [0, 0, 1, 1], [], []>} : vector<1x256xf32>, vector<256x64xf32>, vector<1x64xf32> -> vector<1x64xf32>
    %51 = arith.addf %46, %50 : vector<1x64xf32>
    %52 = vector.extract_strided_slice %15 {offsets = [7, 0], sizes = [1, 256], strides = [1, 1]} : vector<18x256xf32> to vector<1x256xf32>
    %c7 = arith.constant 7 : index
    %c0_30 = arith.constant 0 : index
    %c0_31 = arith.constant 0 : index
    %53 = vector.load %arg4[%c7, %c0_30, %c0_31] : memref<18x256x64xf32, #tpu.memory_space<vmem>>, vector<1x256x64xf32>
    %54 = vector.shape_cast %53 : vector<1x256x64xf32> to vector<256x64xf32>
    %cst_32 = arith.constant dense<0.000000e+00> : vector<1x64xf32>
    %55 = tpu.matmul %52, %54, %cst_32 {dimension_numbers = #tpu.dot_dimension_numbers<[1], [0], [0], [1], [0, 0, 1, 1], [], []>} : vector<1x256xf32>, vector<256x64xf32>, vector<1x64xf32> -> vector<1x64xf32>
    %56 = arith.addf %51, %55 : vector<1x64xf32>
    %57 = vector.extract_strided_slice %15 {offsets = [8, 0], sizes = [1, 256], strides = [1, 1]} : vector<18x256xf32> to vector<1x256xf32>
    %c8 = arith.constant 8 : index
    %c0_33 = arith.constant 0 : index
    %c0_34 = arith.constant 0 : index
    %58 = vector.load %arg4[%c8, %c0_33, %c0_34] : memref<18x256x64xf32, #tpu.memory_space<vmem>>, vector<1x256x64xf32>
    %59 = vector.shape_cast %58 : vector<1x256x64xf32> to vector<256x64xf32>
    %cst_35 = arith.constant dense<0.000000e+00> : vector<1x64xf32>
    %60 = tpu.matmul %57, %59, %cst_35 {dimension_numbers = #tpu.dot_dimension_numbers<[1], [0], [0], [1], [0, 0, 1, 1], [], []>} : vector<1x256xf32>, vector<256x64xf32>, vector<1x64xf32> -> vector<1x64xf32>
    %61 = arith.addf %56, %60 : vector<1x64xf32>
    %62 = vector.extract_strided_slice %15 {offsets = [9, 0], sizes = [1, 256], strides = [1, 1]} : vector<18x256xf32> to vector<1x256xf32>
    %c9 = arith.constant 9 : index
    %c0_36 = arith.constant 0 : index
    %c0_37 = arith.constant 0 : index
    %63 = vector.load %arg4[%c9, %c0_36, %c0_37] : memref<18x256x64xf32, #tpu.memory_space<vmem>>, vector<1x256x64xf32>
    %64 = vector.shape_cast %63 : vector<1x256x64xf32> to vector<256x64xf32>
    %cst_38 = arith.constant dense<0.000000e+00> : vector<1x64xf32>
    %65 = tpu.matmul %62, %64, %cst_38 {dimension_numbers = #tpu.dot_dimension_numbers<[1], [0], [0], [1], [0, 0, 1, 1], [], []>} : vector<1x256xf32>, vector<256x64xf32>, vector<1x64xf32> -> vector<1x64xf32>
    %66 = arith.addf %61, %65 : vector<1x64xf32>
    %67 = vector.extract_strided_slice %15 {offsets = [10, 0], sizes = [1, 256], strides = [1, 1]} : vector<18x256xf32> to vector<1x256xf32>
    %c10 = arith.constant 10 : index
    %c0_39 = arith.constant 0 : index
    %c0_40 = arith.constant 0 : index
    %68 = vector.load %arg4[%c10, %c0_39, %c0_40] : memref<18x256x64xf32, #tpu.memory_space<vmem>>, vector<1x256x64xf32>
    %69 = vector.shape_cast %68 : vector<1x256x64xf32> to vector<256x64xf32>
    %cst_41 = arith.constant dense<0.000000e+00> : vector<1x64xf32>
    %70 = tpu.matmul %67, %69, %cst_41 {dimension_numbers = #tpu.dot_dimension_numbers<[1], [0], [0], [1], [0, 0, 1, 1], [], []>} : vector<1x256xf32>, vector<256x64xf32>, vector<1x64xf32> -> vector<1x64xf32>
    %71 = arith.addf %66, %70 : vector<1x64xf32>
    %72 = vector.extract_strided_slice %15 {offsets = [11, 0], sizes = [1, 256], strides = [1, 1]} : vector<18x256xf32> to vector<1x256xf32>
    %c11 = arith.constant 11 : index
    %c0_42 = arith.constant 0 : index
    %c0_43 = arith.constant 0 : index
    %73 = vector.load %arg4[%c11, %c0_42, %c0_43] : memref<18x256x64xf32, #tpu.memory_space<vmem>>, vector<1x256x64xf32>
    %74 = vector.shape_cast %73 : vector<1x256x64xf32> to vector<256x64xf32>
    %cst_44 = arith.constant dense<0.000000e+00> : vector<1x64xf32>
    %75 = tpu.matmul %72, %74, %cst_44 {dimension_numbers = #tpu.dot_dimension_numbers<[1], [0], [0], [1], [0, 0, 1, 1], [], []>} : vector<1x256xf32>, vector<256x64xf32>, vector<1x64xf32> -> vector<1x64xf32>
    %76 = arith.addf %71, %75 : vector<1x64xf32>
    %77 = vector.extract_strided_slice %15 {offsets = [12, 0], sizes = [1, 256], strides = [1, 1]} : vector<18x256xf32> to vector<1x256xf32>
    %c12 = arith.constant 12 : index
    %c0_45 = arith.constant 0 : index
    %c0_46 = arith.constant 0 : index
    %78 = vector.load %arg4[%c12, %c0_45, %c0_46] : memref<18x256x64xf32, #tpu.memory_space<vmem>>, vector<1x256x64xf32>
    %79 = vector.shape_cast %78 : vector<1x256x64xf32> to vector<256x64xf32>
    %cst_47 = arith.constant dense<0.000000e+00> : vector<1x64xf32>
    %80 = tpu.matmul %77, %79, %cst_47 {dimension_numbers = #tpu.dot_dimension_numbers<[1], [0], [0], [1], [0, 0, 1, 1], [], []>} : vector<1x256xf32>, vector<256x64xf32>, vector<1x64xf32> -> vector<1x64xf32>
    %81 = arith.addf %76, %80 : vector<1x64xf32>
    %82 = vector.extract_strided_slice %15 {offsets = [13, 0], sizes = [1, 256], strides = [1, 1]} : vector<18x256xf32> to vector<1x256xf32>
    %c13 = arith.constant 13 : index
    %c0_48 = arith.constant 0 : index
    %c0_49 = arith.constant 0 : index
    %83 = vector.load %arg4[%c13, %c0_48, %c0_49] : memref<18x256x64xf32, #tpu.memory_space<vmem>>, vector<1x256x64xf32>
    %84 = vector.shape_cast %83 : vector<1x256x64xf32> to vector<256x64xf32>
    %cst_50 = arith.constant dense<0.000000e+00> : vector<1x64xf32>
    %85 = tpu.matmul %82, %84, %cst_50 {dimension_numbers = #tpu.dot_dimension_numbers<[1], [0], [0], [1], [0, 0, 1, 1], [], []>} : vector<1x256xf32>, vector<256x64xf32>, vector<1x64xf32> -> vector<1x64xf32>
    %86 = arith.addf %81, %85 : vector<1x64xf32>
    %87 = vector.extract_strided_slice %15 {offsets = [14, 0], sizes = [1, 256], strides = [1, 1]} : vector<18x256xf32> to vector<1x256xf32>
    %c14 = arith.constant 14 : index
    %c0_51 = arith.constant 0 : index
    %c0_52 = arith.constant 0 : index
    %88 = vector.load %arg4[%c14, %c0_51, %c0_52] : memref<18x256x64xf32, #tpu.memory_space<vmem>>, vector<1x256x64xf32>
    %89 = vector.shape_cast %88 : vector<1x256x64xf32> to vector<256x64xf32>
    %cst_53 = arith.constant dense<0.000000e+00> : vector<1x64xf32>
    %90 = tpu.matmul %87, %89, %cst_53 {dimension_numbers = #tpu.dot_dimension_numbers<[1], [0], [0], [1], [0, 0, 1, 1], [], []>} : vector<1x256xf32>, vector<256x64xf32>, vector<1x64xf32> -> vector<1x64xf32>
    %91 = arith.addf %86, %90 : vector<1x64xf32>
    %92 = vector.extract_strided_slice %15 {offsets = [15, 0], sizes = [1, 256], strides = [1, 1]} : vector<18x256xf32> to vector<1x256xf32>
    %c15 = arith.constant 15 : index
    %c0_54 = arith.constant 0 : index
    %c0_55 = arith.constant 0 : index
    %93 = vector.load %arg4[%c15, %c0_54, %c0_55] : memref<18x256x64xf32, #tpu.memory_space<vmem>>, vector<1x256x64xf32>
    %94 = vector.shape_cast %93 : vector<1x256x64xf32> to vector<256x64xf32>
    %cst_56 = arith.constant dense<0.000000e+00> : vector<1x64xf32>
    %95 = tpu.matmul %92, %94, %cst_56 {dimension_numbers = #tpu.dot_dimension_numbers<[1], [0], [0], [1], [0, 0, 1, 1], [], []>} : vector<1x256xf32>, vector<256x64xf32>, vector<1x64xf32> -> vector<1x64xf32>
    %96 = arith.addf %91, %95 : vector<1x64xf32>
    %97 = vector.extract_strided_slice %15 {offsets = [16, 0], sizes = [1, 256], strides = [1, 1]} : vector<18x256xf32> to vector<1x256xf32>
    %c16 = arith.constant 16 : index
    %c0_57 = arith.constant 0 : index
    %c0_58 = arith.constant 0 : index
    %98 = vector.load %arg4[%c16, %c0_57, %c0_58] : memref<18x256x64xf32, #tpu.memory_space<vmem>>, vector<1x256x64xf32>
    %99 = vector.shape_cast %98 : vector<1x256x64xf32> to vector<256x64xf32>
    %cst_59 = arith.constant dense<0.000000e+00> : vector<1x64xf32>
    %100 = tpu.matmul %97, %99, %cst_59 {dimension_numbers = #tpu.dot_dimension_numbers<[1], [0], [0], [1], [0, 0, 1, 1], [], []>} : vector<1x256xf32>, vector<256x64xf32>, vector<1x64xf32> -> vector<1x64xf32>
    %101 = arith.addf %96, %100 : vector<1x64xf32>
    %102 = vector.extract_strided_slice %15 {offsets = [17, 0], sizes = [1, 256], strides = [1, 1]} : vector<18x256xf32> to vector<1x256xf32>
    %c17 = arith.constant 17 : index
    %c0_60 = arith.constant 0 : index
    %c0_61 = arith.constant 0 : index
    %103 = vector.load %arg4[%c17, %c0_60, %c0_61] : memref<18x256x64xf32, #tpu.memory_space<vmem>>, vector<1x256x64xf32>
    %104 = vector.shape_cast %103 : vector<1x256x64xf32> to vector<256x64xf32>
    %cst_62 = arith.constant dense<0.000000e+00> : vector<1x64xf32>
    %105 = tpu.matmul %102, %104, %cst_62 {dimension_numbers = #tpu.dot_dimension_numbers<[1], [0], [0], [1], [0, 0, 1, 1], [], []>} : vector<1x256xf32>, vector<256x64xf32>, vector<1x64xf32> -> vector<1x64xf32>
    %106 = arith.addf %101, %105 : vector<1x64xf32>
    %c0_63 = arith.constant 0 : index
    %c0_64 = arith.constant 0 : index
    %107 = vector.load %arg5[%c0_63, %c0_64] : memref<1x64xf32, #tpu.memory_space<vmem>>, vector<1x64xf32>
    %108 = arith.addf %106, %107 : vector<1x64xf32>
    %cst_65 = arith.constant 0.000000e+00 : f32
    %109 = vector.broadcast %cst_65 : f32 to vector<1x64xf32>
    %110 = arith.maximumf %108, %109 : vector<1x64xf32>
    %c0_66 = arith.constant 0 : index
    %c0_67 = arith.constant 0 : index
    %111 = vector.load %arg6[%c0_66, %c0_67] : memref<64x128xf32, #tpu.memory_space<vmem>>, vector<64x128xf32>
    %cst_68 = arith.constant dense<0.000000e+00> : vector<1x128xf32>
    %112 = tpu.matmul %110, %111, %cst_68 {dimension_numbers = #tpu.dot_dimension_numbers<[1], [0], [0], [1], [0, 0, 1, 1], [], []>} : vector<1x64xf32>, vector<64x128xf32>, vector<1x128xf32> -> vector<1x128xf32>
    %c0_69 = arith.constant 0 : index
    %c0_70 = arith.constant 0 : index
    %113 = vector.load %arg7[%c0_69, %c0_70] : memref<1x128xf32, #tpu.memory_space<vmem>>, vector<1x128xf32>
    %114 = arith.addf %112, %113 : vector<1x128xf32>
    %c0_71 = arith.constant 0 : index
    %c0_72 = arith.constant 0 : index
    %c0_73 = arith.constant 0 : index
    %115 = vector.load %arg8[%c0_71, %c0_72, %c0_73] : memref<1x1x128xf32, #tpu.memory_space<vmem>>, vector<1x1x128xf32>
    %116 = vector.shape_cast %115 : vector<1x1x128xf32> to vector<1x128xf32>
    %117 = vector.shape_cast %114 : vector<1x128xf32> to vector<1x1x128xf32>
    tpu.vector_store %arg8[%c0_71, %c0_72, %c0_73], %117 {strides = array<i32>} : memref<1x1x128xf32, #tpu.memory_space<vmem>>, vector<1x1x128xf32>,
    return
  }
  func.func @transform_0(%arg0: i32) -> (i32, i32, i32) {
    %c0_i32 = arith.constant 0 : i32
    %c0_i32_0 = arith.constant 0 : i32
    %c0_i32_1 = arith.constant 0 : i32
    return %arg0, %c0_i32, %c0_i32_0 : i32, i32, i32
  }
  func.func @transform_1(%arg0: i32) -> (i32, i32) {
    %c0_i32 = arith.constant 0 : i32
    %c0_i32_0 = arith.constant 0 : i32
    %c0_i32_1 = arith.constant 0 : i32
    return %c0_i32, %c0_i32_0 : i32, i32
  }
  func.func @transform_2(%arg0: i32) -> (i32, i32) {
    %c0_i32 = arith.constant 0 : i32
    %c0_i32_0 = arith.constant 0 : i32
    %c0_i32_1 = arith.constant 0 : i32
    return %c0_i32, %c0_i32_0 : i32, i32
  }
  func.func @transform_3(%arg0: i32) -> (i32, i32, i32) {
    %c0_i32 = arith.constant 0 : i32
    %c0_i32_0 = arith.constant 0 : i32
    %c0_i32_1 = arith.constant 0 : i32
    %c0_i32_2 = arith.constant 0 : i32
    return %c0_i32, %c0_i32_0, %c0_i32_1 : i32, i32, i32
  }
  func.func @transform_4(%arg0: i32) -> (i32, i32) {
    %c0_i32 = arith.constant 0 : i32
    %c0_i32_0 = arith.constant 0 : i32
    %c0_i32_1 = arith.constant 0 : i32
    return %c0_i32, %c0_i32_0 : i32, i32
  }
  func.func @transform_5(%arg0: i32) -> (i32, i32) {
    %c0_i32 = arith.constant 0 : i32
    %c0_i32_0 = arith.constant 0 : i32
    %c0_i32_1 = arith.constant 0 : i32
    return %c0_i32, %c0_i32_0 : i32, i32
  }
  func.func @transform_6(%arg0: i32) -> (i32, i32) {
    %c0_i32 = arith.constant 0 : i32
    %c0_i32_0 = arith.constant 0 : i32
    %c0_i32_1 = arith.constant 0 : i32
    return %c0_i32, %c0_i32_0 : i32, i32
  }
  func.func @transform_7(%arg0: i32) -> (i32, i32, i32) {
    %c0_i32 = arith.constant 0 : i32
    %c0_i32_0 = arith.constant 0 : i32
    %c0_i32_1 = arith.constant 0 : i32
    return %arg0, %c0_i32, %c0_i32_0 : i32, i32, i32
  }
}

</mosaic_0001>

<bundles_post_ra>
// kernel: simple_conv_net_forward.1
= control target key start
LH: loop header
LB: loop body
LE: loop exit
PB: predicated region body
PF: predicated region fallthrough
CT: control target
= control target key end

     0   :  { %12 = vsyncpa [#allocation3], 0  ;;  %s6245_s0 = inlined_call_operand.vmem [shape: f32[2,27,1024], index: 0, kind: input, shape index: {}]   ;;  %s6246_s1 = inlined_call_operand.vmem [shape: f32[18,27], index: 1, kind: input, shape index: {}]   ;;  %s6247_s2 = inlined_call_operand.vmem [shape: f32[18,1], index: 2, kind: input, shape index: {}]   ;;  %s6248_s3 = inlined_call_operand.vmem [shape: f32[18,256,64], index: 3, kind: input, shape index: {}]   ;;  %s6249_s4 = inlined_call_operand.vmem [shape: f32[1,64], index: 4, kind: input, shape index: {}]   ;;  %s6250_s5 = inlined_call_operand.vmem [shape: f32[64,128], index: 5, kind: input, shape index: {}]   ;;  %s6251_s6 = inlined_call_operand.vmem [shape: f32[1,128], index: 6, kind: input, shape index: {}]   ;;  %s6252_s7 = inlined_call_operand.hbm [shape: f32[2,1,128], index: 7, kind: output, shape index: {}]  }
   0x1   :  { %14 = vsyncpa [#allocation3 + $0x1], 0  ;;  %s4199_s24 = smov 0   ;;  %s4201_s25 = smov 0  }
   0x2   :  { %s4203_s26 = smov 0   ;;  %s4205_s27 = smov 0  }
   0x3 LB: > { %s4220_s28 = sadd.s32 4294967295, %s4153_s27   ;;  %s2816_s29 = sadd.s32 4294967294, %s4153_s27   ;;  %s4153_s27 = sphi %s4205_s27, %s6258_s27   ;;  %s4149_s26 = sphi %s4203_s26, %s6257_s26   ;;  %s4145_s25 = sphi %s4201_s25, %s6256_s25   ;;  %s4141_s24 = sphi %s4199_s24, %s6255_s24  }
   0x4   : > { %s4224_s30 = sadd.s32 1, %s4153_s27   ;;  %s179_s8 = sadd.s32 1, %s4149_s26 }
   0x5   : > { %s176_s9 = ssub.s32 %s4153_s27, %s4224_s30  ;;  %p189_p0 = scmp.ne.s32.totalorder %s4149_s26, %s4145_s25 }
   0x6   : > { %p177_p1 = scmp.eq.s32.totalorder %s176_s9, 0  ;;  %p190_p2 = scmp.eq.s32.totalorder %s4220_s28, 1 }
   0x7   : > { %p195_p3 = scmp.ne.s32.totalorder %s4145_s25, %s4141_s24  ;;  %p196_p4 = scmp.eq.s32.totalorder %s2816_s29, 1 }
   0x8   : > { %s4235_s10 = scalar_select %p177_p1, %s4149_s26, %s179_s8  }
   0x9   : > { %p4237_p5 = por %p190_p2, %p189_p0  ;;  %p4241_p6 = por %p196_p4, %p195_p3 }
   0xa   : > { %p2819_p7 = scmp.ge.s32.totalorder %s4153_s27, 1  ;;  %p240_p8 = scmp.lt.s32.totalorder %s4153_s27, 3 }
   0xc   : > { %p241_p9 = pnand %p2819_p7, %p240_p8 }
   0xd   : > { %p271_p10 = scmp.lt.s32.totalorder (!%p241_p9), %s4220_s28, 1  ;;  %s269_s29 = sand.u32 (!%p241_p9), 1, %s4145_s25  }
   0xe   : > { %244 = sbr.rel (%p241_p9) target bundleno = 946 (0x3b2), region = 48  ;;  %s3387_s13 = sshll.u32 (!%p241_p9), %s4220_s28, 4 }
   0xf   : > { %s270_s14 = scalar_lea.vmem (!%p241_p9), [#allocation2], %s269_s29  ;;  %s2749_s19 = scalar_lea.sflag (!%p241_p9), [#allocation3], %s269_s29 }
  0x10   : > { %s4158_s21 = smov (!%p241_p9), [#allocation2]  }
  0x13   : > { %v4155_v0 = vmov 0.0   ;;  %v696_v1 = vld [vmem:[%s6247_s2] sm:$0xff]  ;;  %s272_s15 = scalar_select %p271_p10, %s4220_s28, 1  ;;  %v4156_v2 = vmov 0   ;;  %v698_v3 = vld [vmem:[%s6247_s2 + $0x10] sm:$0x3] }
  0x14   : > { %410 = vmatprep.mubr.f32.mxu1 %v4155_v0  ;;  %576 = vmatprep.mubr.f32.mxu0 %v4155_v0  ;;  %vm321_vm0 = vcmask 1042432   ;;  %v697_v4 = vld [vmem:[%s6247_s2 + $0x8] sm:$0xff]  ;;  %v4278_v13 = vld [vmem:[%s6246_s1] sm:$0xff]  ;;  %vm311_vm1 = vcmask 220160   ;;  %v310_v29 = vld [vmem:[%s6246_s1 + $0x10] sm:$0x3] }
  0x15   : > { %4091 = vset.pattern.permute.xlu0 %v4156_v2  ;;  %4092 = vset.pattern.permute.xlu1 %v4156_v2  ;;  %s3390_s18 = sshll.u32 %s272_s15, 8  ;;  %v309_v22 = vld [vmem:[%s6246_s1 + $0x8] sm:$0xff]  ;;  %v757_v40 = vld [vmem:[%s6248_s3 + $0xf8] sm:$0xff]  ;;  %v756_v43 = vld [vmem:[%s6248_s3 + $0xf0] sm:$0xff]  ;;  %vm4157_vm2 = vmmov 0   ;;  %vm2673_vm3 = vcmask 523264  }
  0x16   : > { %701 = vperm.xlu0 %4091, %v696_v1   ;;  %711 = vperm.xlu1 %4092, %v698_v3   ;;  %s4263_s23 = scalar_lea.vmem %s6245_s0, %s3390_s18  ;;  %v741_v41 = vld [vmem:[%s6248_s3 + $0x78] sm:$0xff]  ;;  %v740_v45 = vld [vmem:[%s6248_s3 + $0x70] sm:$0xff]  ;;  %v755_v47 = vld [vmem:[%s6248_s3 + $0xe8] sm:$0xff]  ;;  %s2761_s15 = sshll.u32 %s270_s14, 4  ;;  %s2762_s15 = int_to_ptr.vmem [resolvable:$true] %s2761_s15 }
  0x17   : > { %v301_v5 = vld [vmem:[%s4263_s23 + $0xc8] sm:$0x7]  ;;  %v300_v6 = vld [vmem:[%s4263_s23 + $0xc0] sm:$0x7]  ;;  %v303_v14 = vld [vmem:[%s4263_s23 + $0xd8] sm:$0x7]  ;;  %s6210_s18 = scalar_lea.hbm %s6252_s7, %s3387_s13 }
  0x18   : > { %v293_v7 = vld [vmem:[%s4263_s23 + $0x88] sm:$0xff]  ;;  %2822 = vmatprep.subr.msk.mxu1 %vm321_vm0, %v301_v5  ;;  %v292_v8 = vld [vmem:[%s4263_s23 + $0x80] sm:$0xff]  ;;  %v302_v17 = vld [vmem:[%s4263_s23 + $0xd0] sm:$0x7]  ;;  %s4093_s20 = scalar_lea.vmem %s2762_s15, 16  ;;  %s4097_s28 = sshll.u32 %s4158_s21, 4  ;;  %s4098_s28 = int_to_ptr.vmem [resolvable:$false] %s4097_s28 }
  0x19   : > { %2823 = vmatpush1.msk.msra.mxu1 %vm321_vm0, %v300_v6  ;;  %v285_v9 = vld [vmem:[%s4263_s23 + $0x48] sm:$0xff]  ;;  %v284_v10 = vld [vmem:[%s4263_s23 + $0x40] sm:$0xff]  ;;  %v295_v18 = vld [vmem:[%s4263_s23 + $0x98] sm:$0xff]  ;;  %p4094_p11 = scmp.ne.s32.totalorder %s2762_s15, %s4093_s20  ;;  %s4099_s22 = scalar_lea.vmem %s4098_s28, 32 }
  0x1a   : > { %706 = vperm.xlu0 %4091, %v697_v4   ;;  %372 = vmatprep.subr.mxu1 %v293_v7  ;;  %v277_v11 = vld [vmem:[%s4263_s23 + $0x8] sm:$0xff]  ;;  %v276_v12 = vld [vmem:[%s4263_s23] sm:$0xff]  ;;  %v294_v20 = vld [vmem:[%s4263_s23 + $0x90] sm:$0xff]  ;;  %p4100_p0 = scmp.lt.s32.totalorder %s2762_s15, %s4098_s28  ;;  %p4101_p1 = scmp.lt.s32.totalorder %s4099_s22, %s4093_s20 }
  0x1b   : > { %373 = vmatpush1.msra.mxu1 %v292_v8  ;;  %v305_v15 = vld [vmem:[%s4263_s23 + $0xe8] sm:$0x7]  ;;  %v304_v16 = vld [vmem:[%s4263_s23 + $0xe0] sm:$0x7]  ;;  %v287_v23 = vld [vmem:[%s4263_s23 + $0x58] sm:$0xff]  ;;  %p4095_p12 = pnand %p4094_p11, %p4237_p5 }
  0x1c   : > { %374 = vmatprep.subr.mxu1 %v285_v9  ;;  %2832 = vmatprep.subr.msk.mxu0 %vm321_vm0, %v305_v15  ;;  %v297_v19 = vld [vmem:[%s4263_s23 + $0xa8] sm:$0xff]  ;;  %v296_v21 = vld [vmem:[%s4263_s23 + $0xa0] sm:$0xff]  ;;  %v286_v24 = vld [vmem:[%s4263_s23 + $0x50] sm:$0xff]  ;;  %p4102_p2 = por %p4101_p1, %p4100_p0 }
  0x1d   : > { %375 = vmatpush1.msra.mxu1 %v284_v10  ;;  %2833 = vmatpush1.msk.msra.mxu0 %vm321_vm0, %v304_v16  ;;  %v279_v25 = vld [vmem:[%s4263_s23 + $0x18] sm:$0xff]  ;;  %v289_v26 = vld [vmem:[%s4263_s23 + $0x68] sm:$0xff]  ;;  %v278_v27 = vld [vmem:[%s4263_s23 + $0x10] sm:$0xff]  ;;  %p4096_p13 = pneg %p4095_p12 }
  0x1e   : > { %376 = vmatprep.subr.mxu1 %v277_v11  ;;  %538 = vmatprep.subr.mxu0 %v297_v19  ;;  %v288_v28 = vld [vmem:[%s4263_s23 + $0x60] sm:$0xff]  ;;  %v307_v30 = vld [vmem:[%s4263_s23 + $0xf8] sm:$0x7]  ;;  %v281_v31 = vld [vmem:[%s4263_s23 + $0x28] sm:$0xff] }
  0x1f   : > { %377 = vmatpush1.msra.mxu1 %v276_v12  ;;  %539 = vmatpush1.msra.mxu0 %v296_v21  ;;  %v280_v32 = vld [vmem:[%s4263_s23 + $0x20] sm:$0xff]  ;;  %v306_v33 = vld [vmem:[%s4263_s23 + $0xf0] sm:$0x7]  ;;  %v299_v34 = vld [vmem:[%s4263_s23 + $0xb8] sm:$0xff]  ;;  %p4103_p3 = pnand %p4102_p2, %p4096_p13 }
  0x20   : > { %2824 = vmatmul.mubr.msk.f32.vlgmr.msra.gmra.mxu1 %vm311_vm1, %v4278_v13  ;;  %2827 = vmatprep.subr.msk.mxu1 %vm321_vm0, %v303_v14  ;;  %v298_v35 = vld [vmem:[%s4263_s23 + $0xb0] sm:$0xff]  ;;  %v291_v36 = vld [vmem:[%s4263_s23 + $0x78] sm:$0xff]  ;;  %v739_v49 = vld [vmem:[%s6248_s3 + $0x68] sm:$0xff] }
  0x21   : > { %2828 = vmatpush1.msk.msra.mxu1 %vm321_vm0, %v302_v17  ;;  %416 = vmatprep.mubr.f32.mxu1 %v4155_v0  ;;  %v290_v37 = vld [vmem:[%s4263_s23 + $0x70] sm:$0xff]  ;;  %v283_v38 = vld [vmem:[%s4263_s23 + $0x38] sm:$0xff]  ;;  %v2871_v50 = vld [vmem:[%s6248_s3 + $0x1e8] sm:$0xff] }
  0x22   : > { %455 = vmatprep.subr.mxu1 %v295_v18  ;;  %540 = vmatprep.subr.mxu0 %v289_v26  ;;  %v282_v39 = vld [vmem:[%s4263_s23 + $0x30] sm:$0xff]  ;;  %v2873_v42 = vld [vmem:[%s6248_s3 + $0x1f8] sm:$0xff]  ;;  %v754_v51 = vld [vmem:[%s6248_s3 + $0xe0] sm:$0xff] }
  0x23   : > { %456 = vmatpush1.msra.mxu1 %v294_v20  ;;  %541 = vmatpush1.msra.mxu0 %v288_v28  ;;  %v2857_v44 = vld [vmem:[%s6248_s3 + $0x178] sm:$0xff]  ;;  %v2872_v46 = vld [vmem:[%s6248_s3 + $0x1f0] sm:$0xff]  ;;  %v2855_v52 = vld [vmem:[%s6248_s3 + $0x168] sm:$0xff] }
  0x24   : > { %2825 = vmatmul.mubr.msk.f32.gmra.mxu1 %vm311_vm1, %v309_v22  ;;  %457 = vmatprep.subr.mxu1 %v287_v23  ;;  %v2856_v48 = vld [vmem:[%s6248_s3 + $0x170] sm:$0xff]  ;;  %v738_v53 = vld [vmem:[%s6248_s3 + $0x60] sm:$0xff]  ;;  %v753_v55 = vld [vmem:[%s6248_s3 + $0xd8] sm:$0xff] }
  0x25   : > { %422 = vmatprep.mubr.f32.mxu1 %v4155_v0  ;;  %458 = vmatpush1.msra.mxu1 %v286_v24  ;;  %v2870_v54 = vld [vmem:[%s6248_s3 + $0x1e0] sm:$0xff]  ;;  %v737_v57 = vld [vmem:[%s6248_s3 + $0x58] sm:$0xff]  ;;  %v752_v59 = vld [vmem:[%s6248_s3 + $0xd0] sm:$0xff] }
  0x26   : > { %459 = vmatprep.subr.mxu1 %v279_v25  ;;  %542 = vmatprep.subr.mxu0 %v281_v31  ;;  %v2854_v56 = vld [vmem:[%s6248_s3 + $0x160] sm:$0xff]  ;;  %v2869_v58 = vld [vmem:[%s6248_s3 + $0x1d8] sm:$0xff]  ;;  %v736_v61 = vld [vmem:[%s6248_s3 + $0x50] sm:$0xff] }
  0x27   : > { %460 = vmatpush1.msra.mxu1 %v278_v27  ;;  %543 = vmatpush1.msra.mxu0 %v280_v32  ;;  %v2853_v60 = vld [vmem:[%s6248_s3 + $0x158] sm:$0xff]  ;;  %v2868_v62 = vld [vmem:[%s6248_s3 + $0x1d0] sm:$0xff]  ;;  %v751_v63 = vld [vmem:[%s6248_s3 + $0xc8] sm:$0xff] }
  0x28   : > { %2826 = vmatmul.mubr.msk.f32.gmra.mxu1 %vm311_vm1, %v310_v29  ;;  %2837 = vmatprep.subr.msk.mxu1 %vm321_vm0, %v307_v30  ;;  %v2852_v1 = vld [vmem:[%s6248_s3 + $0x150] sm:$0xff]  ;;  %v735_v2 = vld [vmem:[%s6248_s3 + $0x48] sm:$0xff]  ;;  %v750_v4 = vld [vmem:[%s6248_s3 + $0xc0] sm:$0xff] }
  0x29   : > { %493 = vmatprep.mubr.f32.mxu1 %v4155_v0  ;;  %2834 = vmatmul.mubr.msk.f32.vlgmr.msra.gmra.mxu0 %vm311_vm1, %v4278_v13  ;;  %v2867_v3 = vld [vmem:[%s6248_s3 + $0x1c8] sm:$0xff]  ;;  %v734_v6 = vld [vmem:[%s6248_s3 + $0x40] sm:$0xff]  ;;  %v749_v8 = vld [vmem:[%s6248_s3 + $0xb8] sm:$0xff] }
  0x2a   : > { %582 = vmatprep.mubr.f32.mxu0 %v4155_v0  ;;  %3391 = vmatprep.subr.mxu0 %v2873_v42  ;;  %v2851_v5 = vld [vmem:[%s6248_s3 + $0x148] sm:$0xff]  ;;  %v2866_v7 = vld [vmem:[%s6248_s3 + $0x1c0] sm:$0xff]  ;;  %v733_v10 = vld [vmem:[%s6248_s3 + $0x38] sm:$0xff] }
  0x2b   : > { %3392 = vmatpush3.msra.mxu0 %v2857_v44  ;;  %v2850_v9 = vld [vmem:[%s6248_s3 + $0x140] sm:$0xff]  ;;  %v2865_v11 = vld [vmem:[%s6248_s3 + $0x1b8] sm:$0xff]  ;;  %v748_v12 = vld [vmem:[%s6248_s3 + $0xb0] sm:$0xff] }
  0x2c   : > { %2829 = vmatmul.mubr.msk.f32.vlgmr.msra.gmra.mxu1 %vm311_vm1, %v4278_v13  ;;  %3393 = vmatprep.subr.mxu0 %v2872_v46  ;;  %v732_v14 = vld [vmem:[%s6248_s3 + $0x30] sm:$0xff]  ;;  %v747_v16 = vld [vmem:[%s6248_s3 + $0xa8] sm:$0xff]  ;;  %v746_v20 = vld [vmem:[%s6248_s3 + $0xa0] sm:$0xff] }
  0x2d   : > { %2838 = vmatpush1.msk.msra.mxu1 %vm321_vm0, %v306_v33  ;;  %499 = vmatprep.mubr.f32.mxu1 %v4155_v0  ;;  %v2864_v15 = vld [vmem:[%s6248_s3 + $0x1b0] sm:$0xff]  ;;  %v731_v18 = vld [vmem:[%s6248_s3 + $0x28] sm:$0xff]  ;;  %v2862_v23 = vld [vmem:[%s6248_s3 + $0x1a0] sm:$0xff] }
  0x2e   : > { %621 = vmatprep.subr.mxu1 %v299_v34  ;;  %2835 = vmatmul.mubr.msk.f32.gmra.mxu0 %vm311_vm1, %v309_v22  ;;  %v2848_v17 = vld [vmem:[%s6248_s3 + $0x130] sm:$0xff]  ;;  %v2863_v19 = vld [vmem:[%s6248_s3 + $0x1a8] sm:$0xff]  ;;  %v745_v24 = vld [vmem:[%s6248_s3 + $0x98] sm:$0xff] }
  0x2f   : > { %622 = vmatpush1.msra.mxu1 %v298_v35  ;;  %588 = vmatprep.mubr.f32.mxu0 %v4155_v0  ;;  %v2847_v21 = vld [vmem:[%s6248_s3 + $0x128] sm:$0xff]  ;;  %v2846_v25 = vld [vmem:[%s6248_s3 + $0x120] sm:$0xff]  ;;  %v729_v26 = vld [vmem:[%s6248_s3 + $0x18] sm:$0xff] }
  0x30   : > { %2830 = vmatmul.mubr.msk.f32.gmra.mxu1 %vm311_vm1, %v309_v22  ;;  %623 = vmatprep.subr.mxu1 %v291_v36  ;;  %v2861_v27 = vld [vmem:[%s6248_s3 + $0x198] sm:$0xff]  ;;  %v744_v28 = vld [vmem:[%s6248_s3 + $0x90] sm:$0xff]  ;;  %v743_v32 = vld [vmem:[%s6248_s3 + $0x88] sm:$0xff] }
  0x31   : > { %505 = vmatprep.mubr.f32.mxu1 %v4155_v0  ;;  %624 = vmatpush1.msra.mxu1 %v290_v37  ;;  %v728_v30 = vld [vmem:[%s6248_s3 + $0x10] sm:$0xff]  ;;  %v727_v34 = vld [vmem:[%s6248_s3 + $0x8] sm:$0xff]  ;;  %v742_v36 = vld [vmem:[%s6248_s3 + $0x80] sm:$0xff] }
  0x32   : > { %625 = vmatprep.subr.mxu1 %v283_v38  ;;  %2836 = vmatmul.mubr.msk.f32.gmra.mxu0 %vm311_vm1, %v310_v29  ;;  %v2860_v31 = vld [vmem:[%s6248_s3 + $0x190] sm:$0xff]  ;;  %v2859_v35 = vld [vmem:[%s6248_s3 + $0x188] sm:$0xff]  ;;  %v726_v38 = vld [vmem:[%s6248_s3] sm:$0xff] }
  0x33   : > { %626 = vmatpush1.msra.mxu1 %v282_v39  ;;  %3394 = vmatpush3.msra.mxu0 %v2856_v48  ;;  %v2844_v33 = vld [vmem:[%s6248_s3 + $0x110] sm:$0xff]  ;;  %v2843_v37 = vld [vmem:[%s6248_s3 + $0x108] sm:$0xff]  ;;  %v2858_v39 = vld [vmem:[%s6248_s3 + $0x180] sm:$0xff] }
  0x34   : > { %2831 = vmatmul.mubr.msk.f32.gmra.mxu1 %vm311_vm1, %v310_v29  ;;  %3426 = vmatprep.subr.mxu1 %v757_v40  ;;  %v2937_v40 = vld [vmem:[%s6248_s3 + $0x3f8] sm:$0xff] }
  0x35   : > { %659 = vmatprep.mubr.f32.mxu1 %v4155_v0  ;;  %3395 = vmatprep.subr.mxu0 %v2871_v50  ;;  %v2905_v42 = vld [vmem:[%s6248_s3 + $0x2f8] sm:$0xff] }
  0x36   : > { %3396 = vmatpush3.msra.mxu0 %v2855_v52 }
  0x37   : > { %3397 = vmatprep.subr.mxu0 %v2870_v54 }
  0x38   : > { %2839 = vmatmul.mubr.msk.f32.vlgmr.msra.gmra.mxu1 %vm311_vm1, %v4278_v13  ;;  %3398 = vmatpush3.msra.mxu0 %v2854_v56  ;;  %v2849_v13 = vld [vmem:[%s6248_s3 + $0x138] sm:$0xff] }
  0x39   : > { %665 = vmatprep.mubr.f32.mxu1 %v4155_v0  ;;  %3427 = vmatpush3.msra.mxu1 %v741_v41  ;;  %v2842_v41 = vld [vmem:[%s6248_s3 + $0x100] sm:$0xff] }
  0x3a   : > { %3428 = vmatprep.subr.mxu1 %v756_v43  ;;  %3399 = vmatprep.subr.mxu0 %v2869_v58 }
  0x3b   : > { %3429 = vmatpush3.msra.mxu1 %v740_v45  ;;  %3400 = vmatpush3.msra.mxu0 %v2853_v60 }
  0x3c   : > { %2840 = vmatmul.mubr.msk.f32.gmra.mxu1 %vm311_vm1, %v309_v22  ;;  %3430 = vmatprep.subr.mxu1 %v755_v47  ;;  %v730_v22 = vld [vmem:[%s6248_s3 + $0x20] sm:$0xff] }
  0x3d   : > { %671 = vmatprep.mubr.f32.mxu1 %v4155_v0  ;;  %3431 = vmatpush3.msra.mxu1 %v739_v49 }
  0x3e   : > { %3432 = vmatprep.subr.mxu1 %v754_v51  ;;  %3401 = vmatprep.subr.mxu0 %v2868_v62 }
  0x3f   : > { %3433 = vmatpush3.msra.mxu1 %v738_v53  ;;  %3402 = vmatpush3.msra.mxu0 %v2852_v1 }
  0x40   : > { %2841 = vmatmul.mubr.msk.f32.gmra.mxu1 %vm311_vm1, %v310_v29  ;;  %3434 = vmatprep.subr.mxu1 %v753_v55  ;;  %v2845_v29 = vld [vmem:[%s6248_s3 + $0x118] sm:$0xff] }
  0x41   : > { %3435 = vmatpush3.msra.mxu1 %v737_v57  ;;  %3403 = vmatprep.subr.mxu0 %v2867_v3 }
  0x42   : > { %3436 = vmatprep.subr.mxu1 %v752_v59  ;;  %3404 = vmatpush3.msra.mxu0 %v2851_v5 }
  0x43   : > { %3437 = vmatpush3.msra.mxu1 %v736_v61  ;;  %3405 = vmatprep.subr.mxu0 %v2866_v7 }
  0x44   : > { %3438 = vmatprep.subr.mxu1 %v751_v63  ;;  %3406 = vmatpush3.msra.mxu0 %v2850_v9 }
  0x45   : > { %3439 = vmatpush3.msra.mxu1 %v735_v2  ;;  %3407 = vmatprep.subr.mxu0 %v2865_v11  ;;  %v2921_v11 = vld [vmem:[%s6248_s3 + $0x378] sm:$0xff] }
  0x46   : > { %3440 = vmatprep.subr.mxu1 %v750_v4  ;;  %3408 = vmatpush3.msra.mxu0 %v2849_v13 }
  0x47   : > { %3441 = vmatpush3.msra.mxu1 %v734_v6  ;;  %3409 = vmatprep.subr.mxu0 %v2864_v15 }
  0x48   : > { %3442 = vmatprep.subr.mxu1 %v749_v8  ;;  %3410 = vmatpush3.msra.mxu0 %v2848_v17  ;;  %v2920_v17 = vld [vmem:[%s6248_s3 + $0x370] sm:$0xff] }
  0x49   : > { %3443 = vmatpush3.msra.mxu1 %v733_v10  ;;  %3411 = vmatprep.subr.mxu0 %v2863_v19 }
  0x4a   : > { %3444 = vmatprep.subr.mxu1 %v748_v12  ;;  %3412 = vmatpush3.msra.mxu0 %v2847_v21  ;;  %v2936_v12 = vld [vmem:[%s6248_s3 + $0x3f0] sm:$0xff] }
  0x4b   : > { %3445 = vmatpush3.msra.mxu1 %v732_v14  ;;  %3413 = vmatprep.subr.mxu0 %v2862_v23  ;;  %v2888_v21 = vld [vmem:[%s6248_s3 + $0x270] sm:$0xff]  ;;  %v2903_v23 = vld [vmem:[%s6248_s3 + $0x2e8] sm:$0xff] }
  0x4c   : > { %3446 = vmatprep.subr.mxu1 %v747_v16  ;;  %3414 = vmatpush3.msra.mxu0 %v2846_v25  ;;  %v2889_v16 = vld [vmem:[%s6248_s3 + $0x278] sm:$0xff]  ;;  %v2887_v25 = vld [vmem:[%s6248_s3 + $0x268] sm:$0xff] }
  0x4d   : > { %3447 = vmatpush3.msra.mxu1 %v731_v18  ;;  %3415 = vmatprep.subr.mxu0 %v2861_v27  ;;  %v2904_v18 = vld [vmem:[%s6248_s3 + $0x2f0] sm:$0xff]  ;;  %v2902_v27 = vld [vmem:[%s6248_s3 + $0x2e0] sm:$0xff] }
  0x4e   : > { %3448 = vmatprep.subr.mxu1 %v746_v20  ;;  %3416 = vmatpush3.msra.mxu0 %v2845_v29  ;;  %v2935_v20 = vld [vmem:[%s6248_s3 + $0x3e8] sm:$0xff]  ;;  %v2886_v29 = vld [vmem:[%s6248_s3 + $0x260] sm:$0xff] }
  0x4f   : > { %3449 = vmatpush3.msra.mxu1 %v730_v22  ;;  %3417 = vmatprep.subr.mxu0 %v2860_v31  ;;  %v2919_v22 = vld [vmem:[%s6248_s3 + $0x368] sm:$0xff]  ;;  %v2901_v31 = vld [vmem:[%s6248_s3 + $0x2d8] sm:$0xff] }
  0x50   : > { %3450 = vmatprep.subr.mxu1 %v745_v24  ;;  %3418 = vmatpush3.msra.mxu0 %v2844_v33  ;;  %v2934_v24 = vld [vmem:[%s6248_s3 + $0x3e0] sm:$0xff]  ;;  %v2885_v33 = vld [vmem:[%s6248_s3 + $0x258] sm:$0xff] }
  0x51   : > { %3451 = vmatpush3.msra.mxu1 %v729_v26  ;;  %3419 = vmatprep.subr.mxu0 %v2859_v35  ;;  %v2918_v26 = vld [vmem:[%s6248_s3 + $0x360] sm:$0xff]  ;;  %v2900_v35 = vld [vmem:[%s6248_s3 + $0x2d0] sm:$0xff] }
  0x52   : > { %3452 = vmatprep.subr.mxu1 %v744_v28  ;;  %3420 = vmatpush3.msra.mxu0 %v2843_v37  ;;  %v2933_v28 = vld [vmem:[%s6248_s3 + $0x3d8] sm:$0xff]  ;;  %v2884_v37 = vld [vmem:[%s6248_s3 + $0x250] sm:$0xff] }
  0x53   : > { %3453 = vmatpush3.msra.mxu1 %v728_v30  ;;  %3421 = vmatprep.subr.mxu0 %v2858_v39  ;;  %v2917_v30 = vld [vmem:[%s6248_s3 + $0x358] sm:$0xff]  ;;  %v2899_v39 = vld [vmem:[%s6248_s3 + $0x2c8] sm:$0xff] }
  0x54   : > { %3454 = vmatprep.subr.mxu1 %v743_v32  ;;  %3422 = vmatpush3.msra.mxu0 %v2842_v41  ;;  %v2932_v32 = vld [vmem:[%s6248_s3 + $0x3d0] sm:$0xff]  ;;  %v2883_v41 = vld [vmem:[%s6248_s3 + $0x248] sm:$0xff] }
  0x55   : > { %3455 = vmatpush3.msra.mxu1 %v727_v34  ;;  %3461 = vmatprep.subr.mxu0 %v2905_v42  ;;  %v2916_v34 = vld [vmem:[%s6248_s3 + $0x350] sm:$0xff]  ;;  %v2914_v42 = vld [vmem:[%s6248_s3 + $0x340] sm:$0xff] }
  0x56   : > { %3456 = vmatprep.subr.mxu1 %v742_v36  ;;  %v2931_v36 = vld [vmem:[%s6248_s3 + $0x3c8] sm:$0xff] }
  0x57   : > { %3457 = vmatpush3.msra.mxu1 %v726_v38  ;;  %v2915_v38 = vld [vmem:[%s6248_s3 + $0x348] sm:$0xff] }
  0x58   : > { %3496 = vmatprep.subr.mxu1 %v2937_v40  ;;  %v2930_v40 = vld [vmem:[%s6248_s3 + $0x3c0] sm:$0xff] }
  0x91   : > { %v702_v5 = vpop.permute.xlu0 %701 }
  0xe0   : > { %v412_v43 = vpop.f32.mrf.mxu1 }
  0xe2   : > { %v414_v44 = vpop.f32.mrf.mxu1 }
  0xe4   : > { %v4540_v45 = vpop.f32.mrf.mxu1 }
  0xe6   : > { %v4542_v46 = vpop.f32.mrf.mxu1 }
  0xe8   : > { %v4544_v47 = vpop.f32.mrf.mxu1 }
  0xe9   : > { %v578_v58 = vpop.f32.mrf.mxu0 }
  0xea   : > { %v4546_v48 = vpop.f32.mrf.mxu1 }
  0xeb   : > { %v580_v63 = vpop.f32.mrf.mxu0 }
  0xec   : > { %v495_v49 = vpop.f32.mrf.mxu1 }
  0xed   : > { %v678_v61 = vmax.f32 %v412_v43, %v495_v49  ;;  %v2898_v43 = vld [vmem:[%s6248_s3 + $0x2c0] sm:$0xff] }
  0xee   : > { %v497_v50 = vpop.f32.mrf.mxu1  ;;  %v2882_v49 = vld [vmem:[%s6248_s3 + $0x240] sm:$0xff] }
  0xef   : > { %v679_v2 = vmax.f32 %v414_v44, %v497_v50  ;;  %v2929_v44 = vld [vmem:[%s6248_s3 + $0x3b8] sm:$0xff] }
  0xf0   : > { %v4548_v51 = vpop.f32.mrf.mxu1  ;;  %v2913_v50 = vld [vmem:[%s6248_s3 + $0x338] sm:$0xff] }
  0xf1   : > { %v680_v52 = vmax.f32 %v4540_v45, %v4548_v51  ;;  %v3071_v45 = vld [vmem:[%s6248_s3 + $0x828] sm:$0xff]  ;;  %v3102_v51 = vld [vmem:[%s6248_s3 + $0x920] sm:$0xff] }
  0xf2   : > { %v4552_v53 = vpop.f32.mrf.mxu1 }
  0xf3   : > { %v681_v54 = vmax.f32 %v4542_v46, %v4552_v53  ;;  %v3006_v46 = vld [vmem:[%s6248_s3 + $0x620] sm:$0xff]  ;;  %v3037_v53 = vld [vmem:[%s6248_s3 + $0x718] sm:$0xff] }
  0xf4   : > { %v4556_v55 = vpop.f32.mrf.mxu1 }
  0xf5   : > { %v682_v56 = vmax.f32 %v4544_v47, %v4556_v55  ;;  %v3327_v47 = vld [vmem:[%s6248_s3 + $0x1028] sm:$0xff]  ;;  %v3358_v55 = vld [vmem:[%s6248_s3 + $0x1120] sm:$0xff] }
  0xf6   : > { %v4560_v57 = vpop.f32.mrf.mxu1 }
  0xf7   : > { %v683_v59 = vmax.f32 %v4546_v48, %v4560_v57  ;;  %v3262_v48 = vld [vmem:[%s6248_s3 + $0xe20] sm:$0xff]  ;;  %v3293_v57 = vld [vmem:[%s6248_s3 + $0xf18] sm:$0xff] }
  0xf8   : > { %v661_v60 = vpop.f32.mrf.mxu1 }
  0xf9   : > { %v684_v62 = vmax.f32 %v578_v58, %v661_v60  ;;  %v2897_v58 = vld [vmem:[%s6248_s3 + $0x2b8] sm:$0xff]  ;;  %v2928_v60 = vld [vmem:[%s6248_s3 + $0x3b0] sm:$0xff] }
  0xfa   : > { %v663_v1 = vpop.f32.mrf.mxu1 }
  0xfb   : > { %v690_v3 = vmax.f32 %v678_v61, %v684_v62  ;;  %v685_v4 = vmax.f32 %v580_v63, %v663_v1  ;;  %v2881_v61 = vld [vmem:[%s6248_s3 + $0x238] sm:$0xff]  ;;  %v2912_v62 = vld [vmem:[%s6248_s3 + $0x330] sm:$0xff]  ;;  %v2927_v1 = vld [vmem:[%s6248_s3 + $0x3a8] sm:$0xff] }
  0xfc   : > { %v2896_v63 = vld [vmem:[%s6248_s3 + $0x2b0] sm:$0xff] }
  0xfd   : > { %v691_v6 = vmax.f32 %v679_v2, %v685_v4  ;;  %v714_v7 = vadd.f32 %v702_v5, %v690_v3  ;;  %v2880_v2 = vld [vmem:[%s6248_s3 + $0x230] sm:$0xff]  ;;  %v2911_v3 = vld [vmem:[%s6248_s3 + $0x328] sm:$0xff] }
  0xfe   : > { %v2895_v4 = vld [vmem:[%s6248_s3 + $0x2a8] sm:$0xff] }
  0xff   : > { %v715_v8 = vadd.f32 %v702_v5, %v691_v6  ;;  %v4564_v9 = vmax.f32 %v714_v7, 0.0  ;;  %v2926_v5 = vld [vmem:[%s6248_s3 + $0x3a0] sm:$0xff]  ;;  %v2879_v6 = vld [vmem:[%s6248_s3 + $0x228] sm:$0xff] }
 0x100   : > { %v2910_v7 = vld [vmem:[%s6248_s3 + $0x320] sm:$0xff] }
 0x101   : > { %v4566_v10 = vmax.f32 %v715_v8, 0.0  ;;  %v793_v15 = vrot.slane %v4564_v9, 1  ;;  %v2894_v8 = vld [vmem:[%s6248_s3 + $0x2a0] sm:$0xff] }
 0x103   : > { %931 = vmatprep.mubr.f32.mxu1 %v4566_v10  ;;  %v794_v13 = vrot.slane %v4566_v10, 1  ;;  %v1079_v14 = vrot.slane %v4566_v10, 3  ;;  %v971_v19 = vrot.slane %v4566_v10, 2 }
 0x104   : > { %932 = vmatmul.mubr.f32.vlgmr.msra.gmra.mxu1 %v4564_v9 }
 0x105   : > { %3497 = vmatpush3.msra.mxu1 %v2921_v11  ;;  %861 = vmatprep.mubr.f32.mxu0 %v794_v13  ;;  %v2925_v11 = vld [vmem:[%s6248_s3 + $0x398] sm:$0xff] }
 0x106   : > { %3498 = vmatprep.subr.mxu1 %v2936_v12  ;;  %1146 = vmatprep.mubr.f32.mxu1 %v1079_v14  ;;  %v2878_v12 = vld [vmem:[%s6248_s3 + $0x220] sm:$0xff]  ;;  %v2909_v13 = vld [vmem:[%s6248_s3 + $0x318] sm:$0xff] }
 0x107   : > { %862 = vmatmul.mubr.f32.vlgmr.msra.gmra.mxu0 %v793_v15  ;;  %3499 = vmatpush3.msra.mxu1 %v2920_v17  ;;  %v2893_v14 = vld [vmem:[%s6248_s3 + $0x298] sm:$0xff]  ;;  %v2924_v15 = vld [vmem:[%s6248_s3 + $0x390] sm:$0xff] }
 0x108   : > { %3462 = vmatpush3.msra.mxu0 %v2889_v16  ;;  %1038 = vmatprep.mubr.f32.mxu0 %v971_v19  ;;  %v2877_v16 = vld [vmem:[%s6248_s3 + $0x218] sm:$0xff]  ;;  %v2908_v17 = vld [vmem:[%s6248_s3 + $0x310] sm:$0xff]  ;;  %v2923_v19 = vld [vmem:[%s6248_s3 + $0x388] sm:$0xff] }
 0x109   : > { %3463 = vmatprep.subr.mxu0 %v2904_v18  ;;  %3500 = vmatprep.subr.mxu1 %v2935_v20  ;;  %v2892_v18 = vld [vmem:[%s6248_s3 + $0x290] sm:$0xff] }
 0x10a   : > { %3464 = vmatpush3.msra.mxu0 %v2888_v21  ;;  %3501 = vmatpush3.msra.mxu1 %v2919_v22  ;;  %v2876_v20 = vld [vmem:[%s6248_s3 + $0x210] sm:$0xff]  ;;  %v2907_v21 = vld [vmem:[%s6248_s3 + $0x308] sm:$0xff] }
 0x10b   : > { %3465 = vmatprep.subr.mxu0 %v2903_v23  ;;  %3502 = vmatprep.subr.mxu1 %v2934_v24  ;;  %v2891_v22 = vld [vmem:[%s6248_s3 + $0x288] sm:$0xff]  ;;  %v2922_v23 = vld [vmem:[%s6248_s3 + $0x380] sm:$0xff] }
 0x10c   : > { %3466 = vmatpush3.msra.mxu0 %v2887_v25  ;;  %3503 = vmatpush3.msra.mxu1 %v2918_v26  ;;  %v2875_v24 = vld [vmem:[%s6248_s3 + $0x208] sm:$0xff]  ;;  %v2906_v25 = vld [vmem:[%s6248_s3 + $0x300] sm:$0xff] }
 0x10d   : > { %3467 = vmatprep.subr.mxu0 %v2902_v27  ;;  %3504 = vmatprep.subr.mxu1 %v2933_v28  ;;  %v2890_v26 = vld [vmem:[%s6248_s3 + $0x280] sm:$0xff]  ;;  %v3001_v27 = vld [vmem:[%s6248_s3 + $0x5f8] sm:$0xff]  ;;  %v1078_v28 = vrot.slane %v4564_v9, 3 }
 0x10e   : > { %3468 = vmatpush3.msra.mxu0 %v2886_v29  ;;  %3505 = vmatpush3.msra.mxu1 %v2917_v30  ;;  %v2874_v29 = vld [vmem:[%s6248_s3 + $0x200] sm:$0xff]  ;;  %v2985_v30 = vld [vmem:[%s6248_s3 + $0x578] sm:$0xff] }
 0x10f   : > { %3469 = vmatprep.subr.mxu0 %v2901_v31  ;;  %3506 = vmatprep.subr.mxu1 %v2932_v32  ;;  %v1295_v31 = vrot.slane %v4566_v10, 5  ;;  %v970_v32 = vrot.slane %v4564_v9, 2 }
 0x110   : > { %3470 = vmatpush3.msra.mxu0 %v2885_v33  ;;  %3507 = vmatpush3.msra.mxu1 %v2916_v34  ;;  %v2969_v33 = vld [vmem:[%s6248_s3 + $0x4f8] sm:$0xff]  ;;  %v3000_v34 = vld [vmem:[%s6248_s3 + $0x5f0] sm:$0xff] }
 0x111   : > { %3471 = vmatprep.subr.mxu0 %v2900_v35  ;;  %3508 = vmatprep.subr.mxu1 %v2931_v36  ;;  %v2953_v35 = vld [vmem:[%s6248_s3 + $0x478] sm:$0xff]  ;;  %v1187_v36 = vrot.slane %v4566_v10, 4 }
 0x112   : > { %3472 = vmatpush3.msra.mxu0 %v2884_v37  ;;  %3509 = vmatpush3.msra.mxu1 %v2915_v38  ;;  %v2984_v37 = vld [vmem:[%s6248_s3 + $0x570] sm:$0xff] }
 0x113   : > { %3473 = vmatprep.subr.mxu0 %v2899_v39  ;;  %3510 = vmatprep.subr.mxu1 %v2930_v40  ;;  %v2968_v38 = vld [vmem:[%s6248_s3 + $0x4f0] sm:$0xff]  ;;  %v2999_v39 = vld [vmem:[%s6248_s3 + $0x5e8] sm:$0xff] }
 0x114   : > { %3474 = vmatpush3.msra.mxu0 %v2883_v41  ;;  %3511 = vmatpush3.msra.mxu1 %v2914_v42  ;;  %v2952_v40 = vld [vmem:[%s6248_s3 + $0x470] sm:$0xff]  ;;  %v2983_v41 = vld [vmem:[%s6248_s3 + $0x568] sm:$0xff] }
 0x115   : > { %3475 = vmatprep.subr.mxu0 %v2898_v43  ;;  %3512 = vmatprep.subr.mxu1 %v2929_v44  ;;  %v2967_v42 = vld [vmem:[%s6248_s3 + $0x4e8] sm:$0xff]  ;;  %v2998_v43 = vld [vmem:[%s6248_s3 + $0x5e0] sm:$0xff] }
 0x116   : > { %3476 = vmatpush3.msra.mxu0 %v2882_v49  ;;  %3513 = vmatpush3.msra.mxu1 %v2913_v50  ;;  %v2951_v44 = vld [vmem:[%s6248_s3 + $0x468] sm:$0xff]  ;;  %v2982_v49 = vld [vmem:[%s6248_s3 + $0x560] sm:$0xff] }
 0x117   : > { %3477 = vmatprep.subr.mxu0 %v2897_v58  ;;  %3514 = vmatprep.subr.mxu1 %v2928_v60  ;;  %v2966_v50 = vld [vmem:[%s6248_s3 + $0x4e0] sm:$0xff]  ;;  %v2997_v58 = vld [vmem:[%s6248_s3 + $0x5d8] sm:$0xff] }
 0x118   : > { %3478 = vmatpush3.msra.mxu0 %v2881_v61  ;;  %3515 = vmatpush3.msra.mxu1 %v2912_v62  ;;  %v2950_v60 = vld [vmem:[%s6248_s3 + $0x460] sm:$0xff]  ;;  %v2981_v61 = vld [vmem:[%s6248_s3 + $0x558] sm:$0xff] }
 0x119   : > { %3479 = vmatprep.subr.mxu0 %v2896_v63  ;;  %3516 = vmatprep.subr.mxu1 %v2927_v1  ;;  %v2965_v62 = vld [vmem:[%s6248_s3 + $0x4d8] sm:$0xff]  ;;  %v2996_v63 = vld [vmem:[%s6248_s3 + $0x5d0] sm:$0xff] }
 0x11a   : > { %3480 = vmatpush3.msra.mxu0 %v2880_v2  ;;  %3517 = vmatpush3.msra.mxu1 %v2911_v3  ;;  %v2949_v1 = vld [vmem:[%s6248_s3 + $0x458] sm:$0xff]  ;;  %v2980_v2 = vld [vmem:[%s6248_s3 + $0x550] sm:$0xff] }
 0x11b   : > { %3481 = vmatprep.subr.mxu0 %v2895_v4  ;;  %3518 = vmatprep.subr.mxu1 %v2926_v5  ;;  %v2964_v3 = vld [vmem:[%s6248_s3 + $0x4d0] sm:$0xff]  ;;  %v2995_v4 = vld [vmem:[%s6248_s3 + $0x5c8] sm:$0xff] }
 0x11c   : > { %3482 = vmatpush3.msra.mxu0 %v2879_v6  ;;  %3519 = vmatpush3.msra.mxu1 %v2910_v7  ;;  %v2948_v5 = vld [vmem:[%s6248_s3 + $0x450] sm:$0xff]  ;;  %v2979_v6 = vld [vmem:[%s6248_s3 + $0x548] sm:$0xff] }
 0x11d   : > { %3483 = vmatprep.subr.mxu0 %v2894_v8  ;;  %3520 = vmatprep.subr.mxu1 %v2925_v11  ;;  %v2963_v7 = vld [vmem:[%s6248_s3 + $0x4c8] sm:$0xff]  ;;  %v2994_v8 = vld [vmem:[%s6248_s3 + $0x5c0] sm:$0xff] }
 0x11e   : > { %3484 = vmatpush3.msra.mxu0 %v2878_v12  ;;  %3521 = vmatpush3.msra.mxu1 %v2909_v13  ;;  %v2947_v11 = vld [vmem:[%s6248_s3 + $0x448] sm:$0xff]  ;;  %v2978_v12 = vld [vmem:[%s6248_s3 + $0x540] sm:$0xff] }
 0x11f   : > { %3485 = vmatprep.subr.mxu0 %v2893_v14  ;;  %3522 = vmatprep.subr.mxu1 %v2924_v15  ;;  %v2962_v13 = vld [vmem:[%s6248_s3 + $0x4c0] sm:$0xff]  ;;  %v2993_v14 = vld [vmem:[%s6248_s3 + $0x5b8] sm:$0xff] }
 0x120   : > { %3486 = vmatpush3.msra.mxu0 %v2877_v16  ;;  %3523 = vmatpush3.msra.mxu1 %v2908_v17  ;;  %v2946_v15 = vld [vmem:[%s6248_s3 + $0x440] sm:$0xff]  ;;  %v2977_v16 = vld [vmem:[%s6248_s3 + $0x538] sm:$0xff] }
 0x121   : > { %3487 = vmatprep.subr.mxu0 %v2892_v18  ;;  %3524 = vmatprep.subr.mxu1 %v2923_v19  ;;  %v2961_v17 = vld [vmem:[%s6248_s3 + $0x4b8] sm:$0xff]  ;;  %v2992_v18 = vld [vmem:[%s6248_s3 + $0x5b0] sm:$0xff] }
 0x122   : > { %3488 = vmatpush3.msra.mxu0 %v2876_v20  ;;  %3525 = vmatpush3.msra.mxu1 %v2907_v21  ;;  %v2945_v19 = vld [vmem:[%s6248_s3 + $0x438] sm:$0xff]  ;;  %v2976_v20 = vld [vmem:[%s6248_s3 + $0x530] sm:$0xff] }
 0x123   : > { %3489 = vmatprep.subr.mxu0 %v2891_v22  ;;  %3526 = vmatprep.subr.mxu1 %v2922_v23  ;;  %v2960_v21 = vld [vmem:[%s6248_s3 + $0x4b0] sm:$0xff]  ;;  %v2991_v22 = vld [vmem:[%s6248_s3 + $0x5a8] sm:$0xff] }
 0x124   : > { %3490 = vmatpush3.msra.mxu0 %v2875_v24  ;;  %3527 = vmatpush3.msra.mxu1 %v2906_v25  ;;  %v2944_v23 = vld [vmem:[%s6248_s3 + $0x430] sm:$0xff]  ;;  %v2975_v24 = vld [vmem:[%s6248_s3 + $0x528] sm:$0xff] }
 0x125   : > { %3491 = vmatprep.subr.mxu0 %v2890_v26  ;;  %1147 = vmatmul.mubr.f32.vlgmr.msra.gmra.mxu1 %v1078_v28  ;;  %v2959_v25 = vld [vmem:[%s6248_s3 + $0x4a8] sm:$0xff]  ;;  %v2990_v26 = vld [vmem:[%s6248_s3 + $0x5a0] sm:$0xff] }
 0x126   : > { %3566 = vmatprep.subr.mxu1 %v3001_v27  ;;  %3492 = vmatpush3.msra.mxu0 %v2874_v29  ;;  %v2943_v27 = vld [vmem:[%s6248_s3 + $0x428] sm:$0xff]  ;;  %v2974_v28 = vld [vmem:[%s6248_s3 + $0x520] sm:$0xff] }
 0x127   : > { %3567 = vmatpush3.msra.mxu1 %v2985_v30  ;;  %1362 = vmatprep.mubr.f32.mxu1 %v1295_v31  ;;  %v2958_v29 = vld [vmem:[%s6248_s3 + $0x4a0] sm:$0xff]  ;;  %v2989_v30 = vld [vmem:[%s6248_s3 + $0x598] sm:$0xff] }
 0x128   : > { %1039 = vmatmul.mubr.f32.vlgmr.msra.gmra.mxu0 %v970_v32  ;;  %3531 = vmatprep.subr.mxu0 %v2969_v33  ;;  %v2942_v31 = vld [vmem:[%s6248_s3 + $0x420] sm:$0xff]  ;;  %v2973_v32 = vld [vmem:[%s6248_s3 + $0x518] sm:$0xff] }
 0x129   : > { %3568 = vmatprep.subr.mxu1 %v3000_v34  ;;  %3532 = vmatpush3.msra.mxu0 %v2953_v35  ;;  %v2957_v33 = vld [vmem:[%s6248_s3 + $0x498] sm:$0xff]  ;;  %v2988_v34 = vld [vmem:[%s6248_s3 + $0x590] sm:$0xff] }
 0x12a   : > { %1254 = vmatprep.mubr.f32.mxu0 %v1187_v36  ;;  %3569 = vmatpush3.msra.mxu1 %v2984_v37  ;;  %v2941_v35 = vld [vmem:[%s6248_s3 + $0x418] sm:$0xff]  ;;  %v2972_v36 = vld [vmem:[%s6248_s3 + $0x510] sm:$0xff] }
 0x12b   : > { %3533 = vmatprep.subr.mxu0 %v2968_v38  ;;  %3570 = vmatprep.subr.mxu1 %v2999_v39  ;;  %v2956_v37 = vld [vmem:[%s6248_s3 + $0x490] sm:$0xff]  ;;  %v2987_v38 = vld [vmem:[%s6248_s3 + $0x588] sm:$0xff] }
 0x12c   : > { %3534 = vmatpush3.msra.mxu0 %v2952_v40  ;;  %3571 = vmatpush3.msra.mxu1 %v2983_v41  ;;  %v2940_v39 = vld [vmem:[%s6248_s3 + $0x410] sm:$0xff]  ;;  %v2971_v40 = vld [vmem:[%s6248_s3 + $0x508] sm:$0xff] }
 0x12d   : > { %3535 = vmatprep.subr.mxu0 %v2967_v42  ;;  %3572 = vmatprep.subr.mxu1 %v2998_v43  ;;  %v2955_v41 = vld [vmem:[%s6248_s3 + $0x488] sm:$0xff]  ;;  %v2986_v42 = vld [vmem:[%s6248_s3 + $0x580] sm:$0xff] }
 0x12e   : > { %3536 = vmatpush3.msra.mxu0 %v2951_v44  ;;  %3573 = vmatpush3.msra.mxu1 %v2982_v49  ;;  %v2939_v43 = vld [vmem:[%s6248_s3 + $0x408] sm:$0xff]  ;;  %v2970_v44 = vld [vmem:[%s6248_s3 + $0x500] sm:$0xff] }
 0x12f   : > { %3537 = vmatprep.subr.mxu0 %v2966_v50  ;;  %3574 = vmatprep.subr.mxu1 %v2997_v58  ;;  %v2954_v49 = vld [vmem:[%s6248_s3 + $0x480] sm:$0xff]  ;;  %v3065_v50 = vld [vmem:[%s6248_s3 + $0x7f8] sm:$0xff]  ;;  %v1294_v58 = vrot.slane %v4564_v9, 5 }
 0x130   : > { %3538 = vmatpush3.msra.mxu0 %v2950_v60  ;;  %3575 = vmatpush3.msra.mxu1 %v2981_v61  ;;  %v2938_v60 = vld [vmem:[%s6248_s3 + $0x400] sm:$0xff]  ;;  %v3049_v61 = vld [vmem:[%s6248_s3 + $0x778] sm:$0xff] }
 0x131   : > { %3539 = vmatprep.subr.mxu0 %v2965_v62  ;;  %3576 = vmatprep.subr.mxu1 %v2996_v63  ;;  %v1511_v62 = vrot.slane %v4566_v10, 7  ;;  %v1186_v63 = vrot.slane %v4564_v9, 4 }
 0x132   : > { %3540 = vmatpush3.msra.mxu0 %v2949_v1  ;;  %3577 = vmatpush3.msra.mxu1 %v2980_v2  ;;  %v3033_v1 = vld [vmem:[%s6248_s3 + $0x6f8] sm:$0xff]  ;;  %v3064_v2 = vld [vmem:[%s6248_s3 + $0x7f0] sm:$0xff] }
 0x133   : > { %3541 = vmatprep.subr.mxu0 %v2964_v3  ;;  %3578 = vmatprep.subr.mxu1 %v2995_v4  ;;  %v3017_v3 = vld [vmem:[%s6248_s3 + $0x678] sm:$0xff]  ;;  %v1403_v4 = vrot.slane %v4566_v10, 6  ;;  %v3047_v10 = vld [vmem:[%s6248_s3 + $0x768] sm:$0xff] }
 0x134   : > { %3542 = vmatpush3.msra.mxu0 %v2948_v5  ;;  %3579 = vmatpush3.msra.mxu1 %v2979_v6  ;;  %v3048_v5 = vld [vmem:[%s6248_s3 + $0x770] sm:$0xff] }
 0x135   : > { %3543 = vmatprep.subr.mxu0 %v2963_v7  ;;  %3580 = vmatprep.subr.mxu1 %v2994_v8  ;;  %v3032_v6 = vld [vmem:[%s6248_s3 + $0x6f0] sm:$0xff]  ;;  %v3063_v7 = vld [vmem:[%s6248_s3 + $0x7e8] sm:$0xff] }
 0x136   : > { %3544 = vmatpush3.msra.mxu0 %v2947_v11  ;;  %3581 = vmatpush3.msra.mxu1 %v2978_v12  ;;  %v3016_v8 = vld [vmem:[%s6248_s3 + $0x670] sm:$0xff]  ;;  %v3031_v11 = vld [vmem:[%s6248_s3 + $0x6e8] sm:$0xff]  ;;  %v3062_v12 = vld [vmem:[%s6248_s3 + $0x7e0] sm:$0xff] }
 0x137   : > { %3545 = vmatprep.subr.mxu0 %v2962_v13  ;;  %3582 = vmatprep.subr.mxu1 %v2993_v14  ;;  %v3015_v13 = vld [vmem:[%s6248_s3 + $0x668] sm:$0xff]  ;;  %v3046_v14 = vld [vmem:[%s6248_s3 + $0x760] sm:$0xff] }
 0x138   : > { %3546 = vmatpush3.msra.mxu0 %v2946_v15  ;;  %3583 = vmatpush3.msra.mxu1 %v2977_v16  ;;  %v3030_v15 = vld [vmem:[%s6248_s3 + $0x6e0] sm:$0xff]  ;;  %v3061_v16 = vld [vmem:[%s6248_s3 + $0x7d8] sm:$0xff] }
 0x139   : > { %3547 = vmatprep.subr.mxu0 %v2961_v17  ;;  %3584 = vmatprep.subr.mxu1 %v2992_v18  ;;  %v3014_v17 = vld [vmem:[%s6248_s3 + $0x660] sm:$0xff]  ;;  %v3045_v18 = vld [vmem:[%s6248_s3 + $0x758] sm:$0xff] }
 0x13a   : > { %3548 = vmatpush3.msra.mxu0 %v2945_v19  ;;  %3585 = vmatpush3.msra.mxu1 %v2976_v20  ;;  %v3029_v19 = vld [vmem:[%s6248_s3 + $0x6d8] sm:$0xff]  ;;  %v3060_v20 = vld [vmem:[%s6248_s3 + $0x7d0] sm:$0xff] }
 0x13b   : > { %3549 = vmatprep.subr.mxu0 %v2960_v21  ;;  %3586 = vmatprep.subr.mxu1 %v2991_v22  ;;  %v3013_v21 = vld [vmem:[%s6248_s3 + $0x658] sm:$0xff]  ;;  %v3044_v22 = vld [vmem:[%s6248_s3 + $0x750] sm:$0xff] }
 0x13c   : > { %3550 = vmatpush3.msra.mxu0 %v2944_v23  ;;  %3587 = vmatpush3.msra.mxu1 %v2975_v24  ;;  %v3028_v23 = vld [vmem:[%s6248_s3 + $0x6d0] sm:$0xff]  ;;  %v5029_v24 = vpop.f32.mrf.mxu0 }
 0x13d   : > { %3551 = vmatprep.subr.mxu0 %v2959_v25  ;;  %3588 = vmatprep.subr.mxu1 %v2990_v26  ;;  %v5031_v25 = vpop.f32.mrf.mxu1  ;;  %v3059_v26 = vld [vmem:[%s6248_s3 + $0x7c8] sm:$0xff] }
 0x13e   : > { %3552 = vmatpush3.msra.mxu0 %v2943_v27  ;;  %3589 = vmatpush3.msra.mxu1 %v2974_v28  ;;  %v3012_v27 = vld [vmem:[%s6248_s3 + $0x650] sm:$0xff]  ;;  %v3043_v28 = vld [vmem:[%s6248_s3 + $0x748] sm:$0xff] }
 0x13f   : > { %3553 = vmatprep.subr.mxu0 %v2958_v29  ;;  %3590 = vmatprep.subr.mxu1 %v2989_v30  ;;  %v3027_v29 = vld [vmem:[%s6248_s3 + $0x6c8] sm:$0xff]  ;;  %v3058_v30 = vld [vmem:[%s6248_s3 + $0x7c0] sm:$0xff] }
 0x140   : > { %3554 = vmatpush3.msra.mxu0 %v2942_v31  ;;  %3591 = vmatpush3.msra.mxu1 %v2973_v32  ;;  %v3011_v31 = vld [vmem:[%s6248_s3 + $0x648] sm:$0xff]  ;;  %v3042_v32 = vld [vmem:[%s6248_s3 + $0x740] sm:$0xff] }
 0x141   : > { %3555 = vmatprep.subr.mxu0 %v2957_v33  ;;  %3592 = vmatprep.subr.mxu1 %v2988_v34  ;;  %v3026_v33 = vld [vmem:[%s6248_s3 + $0x6c0] sm:$0xff]  ;;  %v586_v34 = vpop.f32.mrf.mxu0 }
 0x142   : > { %3556 = vmatpush3.msra.mxu0 %v2941_v35  ;;  %3593 = vmatpush3.msra.mxu1 %v2972_v36  ;;  %v669_v35 = vpop.f32.mrf.mxu1  ;;  %v3057_v36 = vld [vmem:[%s6248_s3 + $0x7b8] sm:$0xff] }
 0x143   : > { %3557 = vmatprep.subr.mxu0 %v2956_v37  ;;  %3594 = vmatprep.subr.mxu1 %v2987_v38  ;;  %v3010_v37 = vld [vmem:[%s6248_s3 + $0x640] sm:$0xff]  ;;  %v3041_v38 = vld [vmem:[%s6248_s3 + $0x738] sm:$0xff] }
 0x144   : > { %3558 = vmatpush3.msra.mxu0 %v2940_v39  ;;  %3595 = vmatpush3.msra.mxu1 %v2971_v40  ;;  %v3025_v39 = vld [vmem:[%s6248_s3 + $0x6b8] sm:$0xff]  ;;  %v3056_v40 = vld [vmem:[%s6248_s3 + $0x7b0] sm:$0xff] }
 0x145   : > { %3559 = vmatprep.subr.mxu0 %v2955_v41  ;;  %3596 = vmatprep.subr.mxu1 %v2986_v42  ;;  %v3009_v41 = vld [vmem:[%s6248_s3 + $0x638] sm:$0xff]  ;;  %v687_v42 = vmax.f32 %v586_v34, %v669_v35  ;;  %v3111_v34 = vld [vmem:[%s6248_s3 + $0x968] sm:$0xff] }
 0x146   : > { %3560 = vmatpush3.msra.mxu0 %v2939_v43  ;;  %3597 = vmatpush3.msra.mxu1 %v2970_v44  ;;  %v3040_v43 = vld [vmem:[%s6248_s3 + $0x730] sm:$0xff]  ;;  %v3095_v35 = vld [vmem:[%s6248_s3 + $0x8e8] sm:$0xff] }
 0x147   : > { %3561 = vmatprep.subr.mxu0 %v2954_v49  ;;  %1363 = vmatmul.mubr.f32.vlgmr.msra.gmra.mxu1 %v1294_v58  ;;  %v3024_v44 = vld [vmem:[%s6248_s3 + $0x6b0] sm:$0xff]  ;;  %v3055_v49 = vld [vmem:[%s6248_s3 + $0x7a8] sm:$0xff] }
 0x148   : > { %3636 = vmatprep.subr.mxu1 %v3065_v50  ;;  %3562 = vmatpush3.msra.mxu0 %v2938_v60  ;;  %v3008_v50 = vld [vmem:[%s6248_s3 + $0x630] sm:$0xff]  ;;  %v3039_v58 = vld [vmem:[%s6248_s3 + $0x728] sm:$0xff] }
 0x149   : > { %3637 = vmatpush3.msra.mxu1 %v3049_v61  ;;  %1578 = vmatprep.mubr.f32.mxu1 %v1511_v62  ;;  %v3023_v60 = vld [vmem:[%s6248_s3 + $0x6a8] sm:$0xff]  ;;  %v3054_v61 = vld [vmem:[%s6248_s3 + $0x7a0] sm:$0xff] }
 0x14a   : > { %1255 = vmatmul.mubr.f32.vlgmr.msra.gmra.mxu0 %v1186_v63  ;;  %3601 = vmatprep.subr.mxu0 %v3033_v1  ;;  %v3007_v62 = vld [vmem:[%s6248_s3 + $0x628] sm:$0xff]  ;;  %v693_v63 = vmax.f32 %v681_v54, %v687_v42  ;;  %v3038_v1 = vld [vmem:[%s6248_s3 + $0x720] sm:$0xff]  ;;  %v3021_v54 = vld [vmem:[%s6248_s3 + $0x698] sm:$0xff] }
 0x14b   : > { %3638 = vmatprep.subr.mxu1 %v3064_v2  ;;  %3602 = vmatpush3.msra.mxu0 %v3017_v3  ;;  %v3022_v2 = vld [vmem:[%s6248_s3 + $0x6a0] sm:$0xff]  ;;  %v3053_v3 = vld [vmem:[%s6248_s3 + $0x798] sm:$0xff] }
 0x14c   : > { %1470 = vmatprep.mubr.f32.mxu0 %v1403_v4  ;;  %3639 = vmatpush3.msra.mxu1 %v3048_v5  ;;  %v5120_v4 = vpop.permute.xlu0 %706  ;;  %v3052_v5 = vld [vmem:[%s6248_s3 + $0x790] sm:$0xff]  ;;  %v3109_v42 = vld [vmem:[%s6248_s3 + $0x958] sm:$0xff] }
 0x14d   : > { %3603 = vmatprep.subr.mxu0 %v3032_v6  ;;  %3640 = vmatprep.subr.mxu1 %v3063_v7  ;;  %v3005_v6 = vld [vmem:[%s6248_s3 + $0x618] sm:$0xff]  ;;  %v717_v7 = vadd.f32 %v5120_v4, %v693_v63  ;;  %v3091_v63 = vld [vmem:[%s6248_s3 + $0x8c8] sm:$0xff] }
 0x14e   : > { %3604 = vmatpush3.msra.mxu0 %v3016_v8  ;;  %3641 = vmatpush3.msra.mxu1 %v3047_v10  ;;  %v3036_v8 = vld [vmem:[%s6248_s3 + $0x710] sm:$0xff] }
 0x14f   : > { %3605 = vmatprep.subr.mxu0 %v3031_v11  ;;  %3642 = vmatprep.subr.mxu1 %v3062_v12  ;;  %v3020_v10 = vld [vmem:[%s6248_s3 + $0x690] sm:$0xff]  ;;  %v3051_v11 = vld [vmem:[%s6248_s3 + $0x788] sm:$0xff] }
 0x150   : > { %3606 = vmatpush3.msra.mxu0 %v3015_v13  ;;  %3643 = vmatpush3.msra.mxu1 %v3046_v14  ;;  %v3004_v12 = vld [vmem:[%s6248_s3 + $0x610] sm:$0xff]  ;;  %v3035_v13 = vld [vmem:[%s6248_s3 + $0x708] sm:$0xff] }
 0x151   : > { %3607 = vmatprep.subr.mxu0 %v3030_v15  ;;  %3644 = vmatprep.subr.mxu1 %v3061_v16  ;;  %v3019_v14 = vld [vmem:[%s6248_s3 + $0x688] sm:$0xff]  ;;  %v3050_v15 = vld [vmem:[%s6248_s3 + $0x780] sm:$0xff] }
 0x152   : > { %3608 = vmatpush3.msra.mxu0 %v3014_v17  ;;  %3645 = vmatpush3.msra.mxu1 %v3045_v18  ;;  %v3003_v16 = vld [vmem:[%s6248_s3 + $0x608] sm:$0xff]  ;;  %v5153_v17 = vmax.f32 %v717_v7, 0.0  ;;  %v3034_v18 = vld [vmem:[%s6248_s3 + $0x700] sm:$0xff]  ;;  %v3089_v7 = vld [vmem:[%s6248_s3 + $0x8b8] sm:$0xff] }
 0x153   : > { %3609 = vmatprep.subr.mxu0 %v3029_v19  ;;  %3646 = vmatprep.subr.mxu1 %v3060_v20  ;;  %v3018_v19 = vld [vmem:[%s6248_s3 + $0x680] sm:$0xff]  ;;  %v3129_v20 = vld [vmem:[%s6248_s3 + $0x9f8] sm:$0xff] }
 0x154   : > { %3610 = vmatpush3.msra.mxu0 %v3013_v21  ;;  %3647 = vmatpush3.msra.mxu1 %v3044_v22  ;;  %v1510_v21 = vrot.slane %v4564_v9, 7  ;;  %v3002_v22 = vld [vmem:[%s6248_s3 + $0x600] sm:$0xff] }
 0x155   : > { %3611 = vmatprep.subr.mxu0 %v3028_v23  ;;  %3648 = vmatprep.subr.mxu1 %v3059_v26  ;;  %v3113_v23 = vld [vmem:[%s6248_s3 + $0x978] sm:$0xff]  ;;  %v1725_v26 = vrot.slane %v5153_v17, 1 }
 0x156   : > { %3612 = vmatpush3.msra.mxu0 %v3012_v27  ;;  %3649 = vmatpush3.msra.mxu1 %v3043_v28  ;;  %v1402_v27 = vrot.slane %v4564_v9, 6  ;;  %v3097_v28 = vld [vmem:[%s6248_s3 + $0x8f8] sm:$0xff]  ;;  %v3112_v9 = vld [vmem:[%s6248_s3 + $0x970] sm:$0xff] }
 0x157   : > { %3613 = vmatprep.subr.mxu0 %v3027_v29  ;;  %3650 = vmatprep.subr.mxu1 %v3058_v30  ;;  %v3128_v29 = vld [vmem:[%s6248_s3 + $0x9f0] sm:$0xff]  ;;  %v3081_v30 = vld [vmem:[%s6248_s3 + $0x878] sm:$0xff] }
 0x158   : > { %3614 = vmatpush3.msra.mxu0 %v3011_v31  ;;  %3651 = vmatpush3.msra.mxu1 %v3042_v32  ;;  %v3096_v31 = vld [vmem:[%s6248_s3 + $0x8f0] sm:$0xff]  ;;  %v3127_v32 = vld [vmem:[%s6248_s3 + $0x9e8] sm:$0xff] }
 0x159   : > { %3615 = vmatprep.subr.mxu0 %v3026_v33  ;;  %3652 = vmatprep.subr.mxu1 %v3057_v36  ;;  %v3080_v33 = vld [vmem:[%s6248_s3 + $0x870] sm:$0xff]  ;;  %v3126_v36 = vld [vmem:[%s6248_s3 + $0x9e0] sm:$0xff] }
 0x15a   : > { %3616 = vmatpush3.msra.mxu0 %v3010_v37  ;;  %3653 = vmatpush3.msra.mxu1 %v3041_v38  ;;  %v3079_v37 = vld [vmem:[%s6248_s3 + $0x868] sm:$0xff]  ;;  %v3110_v38 = vld [vmem:[%s6248_s3 + $0x960] sm:$0xff] }
 0x15b   : > { %3617 = vmatprep.subr.mxu0 %v3025_v39  ;;  %3654 = vmatprep.subr.mxu1 %v3056_v40  ;;  %v3094_v39 = vld [vmem:[%s6248_s3 + $0x8e0] sm:$0xff]  ;;  %v3125_v40 = vld [vmem:[%s6248_s3 + $0x9d8] sm:$0xff] }
 0x15c   : > { %3618 = vmatpush3.msra.mxu0 %v3009_v41  ;;  %3655 = vmatpush3.msra.mxu1 %v3040_v43  ;;  %v3078_v41 = vld [vmem:[%s6248_s3 + $0x860] sm:$0xff]  ;;  %v3093_v43 = vld [vmem:[%s6248_s3 + $0x8d8] sm:$0xff] }
 0x15d   : > { %3619 = vmatprep.subr.mxu0 %v3024_v44  ;;  %3656 = vmatprep.subr.mxu1 %v3055_v49  ;;  %v3124_v44 = vld [vmem:[%s6248_s3 + $0x9d0] sm:$0xff]  ;;  %v3077_v49 = vld [vmem:[%s6248_s3 + $0x858] sm:$0xff] }
 0x15e   : > { %3620 = vmatpush3.msra.mxu0 %v3008_v50  ;;  %3657 = vmatpush3.msra.mxu1 %v3039_v58  ;;  %v3108_v50 = vld [vmem:[%s6248_s3 + $0x950] sm:$0xff] }
 0x15f   : > { %3621 = vmatprep.subr.mxu0 %v3023_v60  ;;  %3658 = vmatprep.subr.mxu1 %v3054_v61  ;;  %v3092_v58 = vld [vmem:[%s6248_s3 + $0x8d0] sm:$0xff]  ;;  %v3123_v60 = vld [vmem:[%s6248_s3 + $0x9c8] sm:$0xff] }
 0x160   : > { %3622 = vmatpush3.msra.mxu0 %v3007_v62  ;;  %3659 = vmatpush3.msra.mxu1 %v3038_v1  ;;  %v3076_v61 = vld [vmem:[%s6248_s3 + $0x850] sm:$0xff]  ;;  %v3107_v62 = vld [vmem:[%s6248_s3 + $0x948] sm:$0xff]  ;;  %v3122_v1 = vld [vmem:[%s6248_s3 + $0x9c0] sm:$0xff] }
 0x161   : > { %3623 = vmatprep.subr.mxu0 %v3022_v2  ;;  %3660 = vmatprep.subr.mxu1 %v3053_v3  ;;  %v3075_v2 = vld [vmem:[%s6248_s3 + $0x848] sm:$0xff]  ;;  %v3106_v3 = vld [vmem:[%s6248_s3 + $0x940] sm:$0xff] }
 0x162   : > { %3624 = vmatpush3.msra.mxu0 %v3006_v46  ;;  %3661 = vmatpush3.msra.mxu1 %v3037_v53  ;;  %v3090_v46 = vld [vmem:[%s6248_s3 + $0x8c0] sm:$0xff]  ;;  %v3121_v53 = vld [vmem:[%s6248_s3 + $0x9b8] sm:$0xff] }
 0x163   : > { %3625 = vmatprep.subr.mxu0 %v3021_v54  ;;  %3662 = vmatprep.subr.mxu1 %v3052_v5  ;;  %v3074_v54 = vld [vmem:[%s6248_s3 + $0x840] sm:$0xff]  ;;  %v686_v5 = vmax.f32 %v5029_v24, %v5031_v25  ;;  %v3073_v24 = vld [vmem:[%s6248_s3 + $0x838] sm:$0xff]  ;;  %v3104_v25 = vld [vmem:[%s6248_s3 + $0x930] sm:$0xff] }
 0x164   : > { %3626 = vmatpush3.msra.mxu0 %v3005_v6  ;;  %3663 = vmatpush3.msra.mxu1 %v3036_v8  ;;  %v3105_v6 = vld [vmem:[%s6248_s3 + $0x938] sm:$0xff]  ;;  %v3120_v8 = vld [vmem:[%s6248_s3 + $0x9b0] sm:$0xff] }
 0x165   : > { %3627 = vmatprep.subr.mxu0 %v3020_v10  ;;  %3664 = vmatprep.subr.mxu1 %v3051_v11  ;;  %v3088_v10 = vld [vmem:[%s6248_s3 + $0x8b0] sm:$0xff]  ;;  %v3119_v11 = vld [vmem:[%s6248_s3 + $0x9a8] sm:$0xff] }
 0x166   : > { %3628 = vmatpush3.msra.mxu0 %v3004_v12  ;;  %3665 = vmatpush3.msra.mxu1 %v3035_v13  ;;  %v3072_v12 = vld [vmem:[%s6248_s3 + $0x830] sm:$0xff]  ;;  %v692_v13 = vmax.f32 %v680_v52, %v686_v5  ;;  %v3086_v52 = vld [vmem:[%s6248_s3 + $0x8a0] sm:$0xff]  ;;  %v3157_v5 = vld [vmem:[%s6248_s3 + $0xad8] sm:$0xff] }
 0x167   : > { %3629 = vmatprep.subr.mxu0 %v3019_v14  ;;  %3666 = vmatprep.subr.mxu1 %v3050_v15  ;;  %v3103_v14 = vld [vmem:[%s6248_s3 + $0x928] sm:$0xff] }
 0x168   : > { %3630 = vmatpush3.msra.mxu0 %v3003_v16  ;;  %3667 = vmatpush3.msra.mxu1 %v3034_v18  ;;  %v3087_v15 = vld [vmem:[%s6248_s3 + $0x8a8] sm:$0xff]  ;;  %v3118_v16 = vld [vmem:[%s6248_s3 + $0x9a0] sm:$0xff]  ;;  %v3117_v18 = vld [vmem:[%s6248_s3 + $0x998] sm:$0xff] }
 0x169   : > { %3631 = vmatprep.subr.mxu0 %v3018_v19  ;;  %1579 = vmatmul.mubr.f32.vlgmr.msra.gmra.mxu1 %v1510_v21  ;;  %v3070_v19 = vld [vmem:[%s6248_s3 + $0x820] sm:$0xff]  ;;  %v3101_v21 = vld [vmem:[%s6248_s3 + $0x918] sm:$0xff] }
 0x16a   : > { %3706 = vmatprep.subr.mxu1 %v3129_v20  ;;  %3632 = vmatpush3.msra.mxu0 %v3002_v22  ;;  %v716_v20 = vadd.f32 %v5120_v4, %v692_v13  ;;  %v3085_v22 = vld [vmem:[%s6248_s3 + $0x898] sm:$0xff]  ;;  %v3186_v13 = vld [vmem:[%s6248_s3 + $0xbc0] sm:$0xff] }
 0x16b   : > { %3707 = vmatpush3.msra.mxu1 %v3113_v23  ;;  %1792 = vmatprep.mubr.f32.mxu1 %v1725_v26  ;;  %v3116_v23 = vld [vmem:[%s6248_s3 + $0x990] sm:$0xff]  ;;  %v3069_v4 = vld [vmem:[%s6248_s3 + $0x818] sm:$0xff] }
 0x16c   : > { %1471 = vmatmul.mubr.f32.vlgmr.msra.gmra.mxu0 %v1402_v27  ;;  %3671 = vmatprep.subr.mxu0 %v3097_v28  ;;  %v3100_v26 = vld [vmem:[%s6248_s3 + $0x910] sm:$0xff]  ;;  %v3115_v28 = vld [vmem:[%s6248_s3 + $0x988] sm:$0xff] }
 0x16d   : > { %3708 = vmatprep.subr.mxu1 %v3128_v29  ;;  %3672 = vmatpush3.msra.mxu0 %v3081_v30  ;;  %v3084_v27 = vld [vmem:[%s6248_s3 + $0x890] sm:$0xff]  ;;  %v5345_v30 = vmax.f32 %v716_v20, 0.0  ;;  %v3137_v20 = vld [vmem:[%s6248_s3 + $0xa38] sm:$0xff] }
 0x16e   : > { %1682 = vmatprep.mubr.f32.mxu0 %v5153_v17  ;;  %3709 = vmatpush3.msra.mxu1 %v3112_v9  ;;  %v3068_v29 = vld [vmem:[%s6248_s3 + $0x810] sm:$0xff]  ;;  %v3099_v9 = vld [vmem:[%s6248_s3 + $0x908] sm:$0xff] }
 0x16f   : > { %3673 = vmatprep.subr.mxu0 %v3096_v31  ;;  %3710 = vmatprep.subr.mxu1 %v3127_v32  ;;  %v3083_v31 = vld [vmem:[%s6248_s3 + $0x888] sm:$0xff]  ;;  %v3114_v32 = vld [vmem:[%s6248_s3 + $0x980] sm:$0xff] }
 0x170   : > { %3674 = vmatpush3.msra.mxu0 %v3080_v33  ;;  %3711 = vmatpush3.msra.mxu1 %v3111_v34  ;;  %v3067_v33 = vld [vmem:[%s6248_s3 + $0x808] sm:$0xff]  ;;  %v3098_v34 = vld [vmem:[%s6248_s3 + $0x900] sm:$0xff] }
 0x171   : > { %3675 = vmatprep.subr.mxu0 %v3095_v35  ;;  %3712 = vmatprep.subr.mxu1 %v3126_v36  ;;  %v3082_v35 = vld [vmem:[%s6248_s3 + $0x880] sm:$0xff]  ;;  %v3193_v36 = vld [vmem:[%s6248_s3 + $0xbf8] sm:$0xff] }
 0x172   : > { %3676 = vmatpush3.msra.mxu0 %v3079_v37  ;;  %3713 = vmatpush3.msra.mxu1 %v3110_v38  ;;  %v1724_v37 = vrot.slane %v5345_v30, 1  ;;  %v3066_v38 = vld [vmem:[%s6248_s3 + $0x800] sm:$0xff] }
 0x173   : > { %3677 = vmatprep.subr.mxu0 %v3094_v39  ;;  %3714 = vmatprep.subr.mxu1 %v3125_v40  ;;  %v3177_v39 = vld [vmem:[%s6248_s3 + $0xb78] sm:$0xff]  ;;  %v1941_v40 = vrot.slane %v5153_v17, 3 }
 0x174   : > { %3678 = vmatpush3.msra.mxu0 %v3078_v41  ;;  %3715 = vmatpush3.msra.mxu1 %v3109_v42  ;;  %v3161_v41 = vld [vmem:[%s6248_s3 + $0xaf8] sm:$0xff]  ;;  %v3192_v42 = vld [vmem:[%s6248_s3 + $0xbf0] sm:$0xff] }
 0x175   : > { %3679 = vmatprep.subr.mxu0 %v3093_v43  ;;  %3716 = vmatprep.subr.mxu1 %v3124_v44  ;;  %v3145_v43 = vld [vmem:[%s6248_s3 + $0xa78] sm:$0xff]  ;;  %v1833_v44 = vrot.slane %v5153_v17, 2 }
 0x176   : > { %3680 = vmatpush3.msra.mxu0 %v3077_v49  ;;  %3717 = vmatpush3.msra.mxu1 %v3108_v50  ;;  %v3176_v49 = vld [vmem:[%s6248_s3 + $0xb70] sm:$0xff] }
 0x177   : > { %3681 = vmatprep.subr.mxu0 %v3092_v58  ;;  %3718 = vmatprep.subr.mxu1 %v3123_v60  ;;  %v3160_v50 = vld [vmem:[%s6248_s3 + $0xaf0] sm:$0xff]  ;;  %v3191_v58 = vld [vmem:[%s6248_s3 + $0xbe8] sm:$0xff] }
 0x178   : > { %3682 = vmatpush3.msra.mxu0 %v3076_v61  ;;  %3719 = vmatpush3.msra.mxu1 %v3107_v62  ;;  %v3144_v60 = vld [vmem:[%s6248_s3 + $0xa70] sm:$0xff]  ;;  %v3175_v61 = vld [vmem:[%s6248_s3 + $0xb68] sm:$0xff] }
 0x179   : > { %3683 = vmatprep.subr.mxu0 %v3091_v63  ;;  %3720 = vmatprep.subr.mxu1 %v3122_v1  ;;  %v3159_v62 = vld [vmem:[%s6248_s3 + $0xae8] sm:$0xff]  ;;  %v3190_v63 = vld [vmem:[%s6248_s3 + $0xbe0] sm:$0xff] }
 0x17a   : > { %3684 = vmatpush3.msra.mxu0 %v3075_v2  ;;  %3721 = vmatpush3.msra.mxu1 %v3106_v3  ;;  %v3143_v1 = vld [vmem:[%s6248_s3 + $0xa68] sm:$0xff]  ;;  %v3174_v2 = vld [vmem:[%s6248_s3 + $0xb60] sm:$0xff] }
 0x17b   : > { %3685 = vmatprep.subr.mxu0 %v3090_v46  ;;  %3722 = vmatprep.subr.mxu1 %v3121_v53  ;;  %v3158_v3 = vld [vmem:[%s6248_s3 + $0xae0] sm:$0xff]  ;;  %v3189_v46 = vld [vmem:[%s6248_s3 + $0xbd8] sm:$0xff] }
 0x17c   : > { %3686 = vmatpush3.msra.mxu0 %v3074_v54  ;;  %3723 = vmatpush3.msra.mxu1 %v3105_v6  ;;  %v3142_v53 = vld [vmem:[%s6248_s3 + $0xa60] sm:$0xff]  ;;  %v3173_v54 = vld [vmem:[%s6248_s3 + $0xb58] sm:$0xff]  ;;  %v3188_v6 = vld [vmem:[%s6248_s3 + $0xbd0] sm:$0xff] }
 0x17d   : > { %3687 = vmatprep.subr.mxu0 %v3089_v7  ;;  %3724 = vmatprep.subr.mxu1 %v3120_v8  ;;  %v3141_v7 = vld [vmem:[%s6248_s3 + $0xa58] sm:$0xff]  ;;  %v3172_v8 = vld [vmem:[%s6248_s3 + $0xb50] sm:$0xff] }
 0x17e   : > { %3688 = vmatpush3.msra.mxu0 %v3073_v24  ;;  %3725 = vmatpush3.msra.mxu1 %v3104_v25  ;;  %v3156_v24 = vld [vmem:[%s6248_s3 + $0xad0] sm:$0xff]  ;;  %v3187_v25 = vld [vmem:[%s6248_s3 + $0xbc8] sm:$0xff] }
 0x17f   : > { %3689 = vmatprep.subr.mxu0 %v3088_v10  ;;  %3726 = vmatprep.subr.mxu1 %v3119_v11  ;;  %v3140_v10 = vld [vmem:[%s6248_s3 + $0xa50] sm:$0xff]  ;;  %v3171_v11 = vld [vmem:[%s6248_s3 + $0xb48] sm:$0xff] }
 0x180   : > { %3690 = vmatpush3.msra.mxu0 %v3072_v12  ;;  %3727 = vmatpush3.msra.mxu1 %v3103_v14  ;;  %v3155_v12 = vld [vmem:[%s6248_s3 + $0xac8] sm:$0xff] }
 0x181   : > { %3691 = vmatprep.subr.mxu0 %v3087_v15  ;;  %3728 = vmatprep.subr.mxu1 %v3118_v16  ;;  %v3139_v14 = vld [vmem:[%s6248_s3 + $0xa48] sm:$0xff]  ;;  %v3170_v15 = vld [vmem:[%s6248_s3 + $0xb40] sm:$0xff] }
 0x182   : > { %3692 = vmatpush3.msra.mxu0 %v3071_v45  ;;  %3729 = vmatpush3.msra.mxu1 %v3102_v51  ;;  %v3154_v16 = vld [vmem:[%s6248_s3 + $0xac0] sm:$0xff]  ;;  %v3185_v45 = vld [vmem:[%s6248_s3 + $0xbb8] sm:$0xff] }
 0x183   : > { %3693 = vmatprep.subr.mxu0 %v3086_v52  ;;  %3730 = vmatprep.subr.mxu1 %v3117_v18  ;;  %v3138_v51 = vld [vmem:[%s6248_s3 + $0xa40] sm:$0xff]  ;;  %v3169_v52 = vld [vmem:[%s6248_s3 + $0xb38] sm:$0xff] }
 0x184   : > { %3694 = vmatpush3.msra.mxu0 %v3070_v19  ;;  %3731 = vmatpush3.msra.mxu1 %v3101_v21  ;;  %v3153_v18 = vld [vmem:[%s6248_s3 + $0xab8] sm:$0xff]  ;;  %v3184_v19 = vld [vmem:[%s6248_s3 + $0xbb0] sm:$0xff] }
 0x185   : > { %3695 = vmatprep.subr.mxu0 %v3085_v22  ;;  %3732 = vmatprep.subr.mxu1 %v3116_v23  ;;  %v3168_v21 = vld [vmem:[%s6248_s3 + $0xb30] sm:$0xff]  ;;  %v3183_v23 = vld [vmem:[%s6248_s3 + $0xba8] sm:$0xff] }
 0x186   : > { %3696 = vmatpush3.msra.mxu0 %v3069_v4  ;;  %3733 = vmatpush3.msra.mxu1 %v3100_v26  ;;  %v3152_v22 = vld [vmem:[%s6248_s3 + $0xab0] sm:$0xff]  ;;  %v3167_v26 = vld [vmem:[%s6248_s3 + $0xb28] sm:$0xff] }
 0x187   : > { %3697 = vmatprep.subr.mxu0 %v3084_v27  ;;  %3734 = vmatprep.subr.mxu1 %v3115_v28  ;;  %v3136_v4 = vld [vmem:[%s6248_s3 + $0xa30] sm:$0xff]  ;;  %v3151_v27 = vld [vmem:[%s6248_s3 + $0xaa8] sm:$0xff]  ;;  %v3182_v28 = vld [vmem:[%s6248_s3 + $0xba0] sm:$0xff] }
 0x188   : > { %3698 = vmatpush3.msra.mxu0 %v3068_v29  ;;  %3735 = vmatpush3.msra.mxu1 %v3099_v9  ;;  %v3135_v29 = vld [vmem:[%s6248_s3 + $0xa28] sm:$0xff]  ;;  %v3166_v9 = vld [vmem:[%s6248_s3 + $0xb20] sm:$0xff] }
 0x189   : > { %3699 = vmatprep.subr.mxu0 %v3083_v31  ;;  %3736 = vmatprep.subr.mxu1 %v3114_v32  ;;  %v3150_v31 = vld [vmem:[%s6248_s3 + $0xaa0] sm:$0xff]  ;;  %v3181_v32 = vld [vmem:[%s6248_s3 + $0xb98] sm:$0xff] }
 0x18a   : > { %3700 = vmatpush3.msra.mxu0 %v3067_v33  ;;  %3737 = vmatpush3.msra.mxu1 %v3098_v34  ;;  %v3134_v33 = vld [vmem:[%s6248_s3 + $0xa20] sm:$0xff]  ;;  %v3165_v34 = vld [vmem:[%s6248_s3 + $0xb18] sm:$0xff] }
 0x18b   : > { %3701 = vmatprep.subr.mxu0 %v3082_v35  ;;  %1793 = vmatmul.mubr.f32.vlgmr.msra.gmra.mxu1 %v1724_v37  ;;  %v3149_v35 = vld [vmem:[%s6248_s3 + $0xa98] sm:$0xff] }
 0x18c   : > { %3776 = vmatprep.subr.mxu1 %v3193_v36  ;;  %3702 = vmatpush3.msra.mxu0 %v3066_v38  ;;  %v3180_v36 = vld [vmem:[%s6248_s3 + $0xb90] sm:$0xff]  ;;  %v3133_v37 = vld [vmem:[%s6248_s3 + $0xa18] sm:$0xff] }
 0x18d   : > { %3777 = vmatpush3.msra.mxu1 %v3177_v39  ;;  %2008 = vmatprep.mubr.f32.mxu1 %v1941_v40  ;;  %v3164_v38 = vld [vmem:[%s6248_s3 + $0xb10] sm:$0xff]  ;;  %v3179_v40 = vld [vmem:[%s6248_s3 + $0xb88] sm:$0xff] }
 0x18e   : > { %1683 = vmatmul.mubr.f32.vlgmr.msra.gmra.mxu0 %v5345_v30  ;;  %3741 = vmatprep.subr.mxu0 %v3161_v41  ;;  %v3148_v39 = vld [vmem:[%s6248_s3 + $0xa90] sm:$0xff] }
 0x18f   : > { %3778 = vmatprep.subr.mxu1 %v3192_v42  ;;  %3742 = vmatpush3.msra.mxu0 %v3145_v43  ;;  %v3132_v41 = vld [vmem:[%s6248_s3 + $0xa10] sm:$0xff]  ;;  %v3163_v42 = vld [vmem:[%s6248_s3 + $0xb08] sm:$0xff] }
 0x190   : > { %1900 = vmatprep.mubr.f32.mxu0 %v1833_v44  ;;  %3779 = vmatpush3.msra.mxu1 %v3176_v49  ;;  %v3147_v43 = vld [vmem:[%s6248_s3 + $0xa88] sm:$0xff]  ;;  %v3178_v44 = vld [vmem:[%s6248_s3 + $0xb80] sm:$0xff] }
 0x191   : > { %3743 = vmatprep.subr.mxu0 %v3160_v50  ;;  %3780 = vmatprep.subr.mxu1 %v3191_v58  ;;  %v3131_v49 = vld [vmem:[%s6248_s3 + $0xa08] sm:$0xff]  ;;  %v3162_v50 = vld [vmem:[%s6248_s3 + $0xb00] sm:$0xff] }
 0x192   : > { %3744 = vmatpush3.msra.mxu0 %v3144_v60  ;;  %3781 = vmatpush3.msra.mxu1 %v3175_v61  ;;  %v3146_v58 = vld [vmem:[%s6248_s3 + $0xa80] sm:$0xff]  ;;  %v3257_v60 = vld [vmem:[%s6248_s3 + $0xdf8] sm:$0xff]  ;;  %v1940_v61 = vrot.slane %v5345_v30, 3 }
 0x193   : > { %3745 = vmatprep.subr.mxu0 %v3159_v62  ;;  %3782 = vmatprep.subr.mxu1 %v3190_v63  ;;  %v3130_v62 = vld [vmem:[%s6248_s3 + $0xa00] sm:$0xff]  ;;  %v3241_v63 = vld [vmem:[%s6248_s3 + $0xd78] sm:$0xff] }
 0x194   : > { %3746 = vmatpush3.msra.mxu0 %v3143_v1  ;;  %3783 = vmatpush3.msra.mxu1 %v3174_v2  ;;  %v2157_v1 = vrot.slane %v5153_v17, 5  ;;  %v1832_v2 = vrot.slane %v5345_v30, 2 }
 0x195   : > { %3747 = vmatprep.subr.mxu0 %v3158_v3  ;;  %3784 = vmatprep.subr.mxu1 %v3189_v46  ;;  %v3225_v3 = vld [vmem:[%s6248_s3 + $0xcf8] sm:$0xff]  ;;  %v3256_v46 = vld [vmem:[%s6248_s3 + $0xdf0] sm:$0xff] }
 0x196   : > { %3748 = vmatpush3.msra.mxu0 %v3142_v53  ;;  %3785 = vmatpush3.msra.mxu1 %v3173_v54  ;;  %v3209_v53 = vld [vmem:[%s6248_s3 + $0xc78] sm:$0xff]  ;;  %v2049_v54 = vrot.slane %v5153_v17, 4 }
 0x197   : > { %3749 = vmatprep.subr.mxu0 %v3157_v5  ;;  %3786 = vmatprep.subr.mxu1 %v3188_v6  ;;  %v3240_v5 = vld [vmem:[%s6248_s3 + $0xd70] sm:$0xff] }
 0x198   : > { %3750 = vmatpush3.msra.mxu0 %v3141_v7  ;;  %3787 = vmatpush3.msra.mxu1 %v3172_v8  ;;  %v3224_v6 = vld [vmem:[%s6248_s3 + $0xcf0] sm:$0xff]  ;;  %v3255_v7 = vld [vmem:[%s6248_s3 + $0xde8] sm:$0xff] }
 0x199   : > { %3751 = vmatprep.subr.mxu0 %v3156_v24  ;;  %3788 = vmatprep.subr.mxu1 %v3187_v25  ;;  %v3208_v8 = vld [vmem:[%s6248_s3 + $0xc70] sm:$0xff]  ;;  %v3239_v24 = vld [vmem:[%s6248_s3 + $0xd68] sm:$0xff] }
 0x19a   : > { %3752 = vmatpush3.msra.mxu0 %v3140_v10  ;;  %3789 = vmatpush3.msra.mxu1 %v3171_v11  ;;  %v3223_v25 = vld [vmem:[%s6248_s3 + $0xce8] sm:$0xff]  ;;  %v3254_v10 = vld [vmem:[%s6248_s3 + $0xde0] sm:$0xff] }
 0x19b   : > { %3753 = vmatprep.subr.mxu0 %v3155_v12  ;;  %3790 = vmatprep.subr.mxu1 %v3186_v13  ;;  %v3207_v11 = vld [vmem:[%s6248_s3 + $0xc68] sm:$0xff]  ;;  %v3238_v12 = vld [vmem:[%s6248_s3 + $0xd60] sm:$0xff] }
 0x19c   : > { %3754 = vmatpush3.msra.mxu0 %v3139_v14  ;;  %3791 = vmatpush3.msra.mxu1 %v3170_v15  ;;  %v3222_v13 = vld [vmem:[%s6248_s3 + $0xce0] sm:$0xff]  ;;  %v3253_v14 = vld [vmem:[%s6248_s3 + $0xdd8] sm:$0xff] }
 0x19d   : > { %3755 = vmatprep.subr.mxu0 %v3154_v16  ;;  %3792 = vmatprep.subr.mxu1 %v3185_v45  ;;  %v3206_v15 = vld [vmem:[%s6248_s3 + $0xc60] sm:$0xff]  ;;  %v3237_v16 = vld [vmem:[%s6248_s3 + $0xd58] sm:$0xff] }
 0x19e   : > { %3756 = vmatpush3.msra.mxu0 %v3138_v51  ;;  %3793 = vmatpush3.msra.mxu1 %v3169_v52  ;;  %v3221_v45 = vld [vmem:[%s6248_s3 + $0xcd8] sm:$0xff]  ;;  %v3252_v51 = vld [vmem:[%s6248_s3 + $0xdd0] sm:$0xff] }
 0x19f   : > { %3757 = vmatprep.subr.mxu0 %v3153_v18  ;;  %3794 = vmatprep.subr.mxu1 %v3184_v19  ;;  %v3205_v52 = vld [vmem:[%s6248_s3 + $0xc58] sm:$0xff]  ;;  %v3236_v18 = vld [vmem:[%s6248_s3 + $0xd50] sm:$0xff] }
 0x1a0   : > { %3758 = vmatpush3.msra.mxu0 %v3137_v20  ;;  %3795 = vmatpush3.msra.mxu1 %v3168_v21  ;;  %v3220_v19 = vld [vmem:[%s6248_s3 + $0xcd0] sm:$0xff]  ;;  %v3251_v20 = vld [vmem:[%s6248_s3 + $0xdc8] sm:$0xff] }
 0x1a1   : > { %3759 = vmatprep.subr.mxu0 %v3152_v22  ;;  %3796 = vmatprep.subr.mxu1 %v3183_v23  ;;  %v3204_v21 = vld [vmem:[%s6248_s3 + $0xc50] sm:$0xff]  ;;  %v3235_v22 = vld [vmem:[%s6248_s3 + $0xd48] sm:$0xff] }
 0x1a2   : > { %3760 = vmatpush3.msra.mxu0 %v3136_v4  ;;  %3797 = vmatpush3.msra.mxu1 %v3167_v26  ;;  %v3219_v23 = vld [vmem:[%s6248_s3 + $0xcc8] sm:$0xff]  ;;  %v3250_v4 = vld [vmem:[%s6248_s3 + $0xdc0] sm:$0xff] }
 0x1a3   : > { %3761 = vmatprep.subr.mxu0 %v3151_v27  ;;  %3798 = vmatprep.subr.mxu1 %v3182_v28  ;;  %v3203_v26 = vld [vmem:[%s6248_s3 + $0xc48] sm:$0xff]  ;;  %v3234_v27 = vld [vmem:[%s6248_s3 + $0xd40] sm:$0xff] }
 0x1a4   : > { %3762 = vmatpush3.msra.mxu0 %v3135_v29  ;;  %3799 = vmatpush3.msra.mxu1 %v3166_v9  ;;  %v3218_v28 = vld [vmem:[%s6248_s3 + $0xcc0] sm:$0xff]  ;;  %v3249_v29 = vld [vmem:[%s6248_s3 + $0xdb8] sm:$0xff] }
 0x1a5   : > { %3763 = vmatprep.subr.mxu0 %v3150_v31  ;;  %3800 = vmatprep.subr.mxu1 %v3181_v32  ;;  %v3202_v9 = vld [vmem:[%s6248_s3 + $0xc40] sm:$0xff]  ;;  %v3233_v31 = vld [vmem:[%s6248_s3 + $0xd38] sm:$0xff] }
 0x1a6   : > { %3764 = vmatpush3.msra.mxu0 %v3134_v33  ;;  %3801 = vmatpush3.msra.mxu1 %v3165_v34  ;;  %v3217_v32 = vld [vmem:[%s6248_s3 + $0xcb8] sm:$0xff]  ;;  %v3248_v33 = vld [vmem:[%s6248_s3 + $0xdb0] sm:$0xff] }
 0x1a7   : > { %3765 = vmatprep.subr.mxu0 %v3149_v35  ;;  %3802 = vmatprep.subr.mxu1 %v3180_v36  ;;  %v3201_v34 = vld [vmem:[%s6248_s3 + $0xc38] sm:$0xff]  ;;  %v3232_v35 = vld [vmem:[%s6248_s3 + $0xd30] sm:$0xff] }
 0x1a8   : > { %3766 = vmatpush3.msra.mxu0 %v3133_v37  ;;  %3803 = vmatpush3.msra.mxu1 %v3164_v38  ;;  %v3216_v36 = vld [vmem:[%s6248_s3 + $0xcb0] sm:$0xff]  ;;  %v3247_v37 = vld [vmem:[%s6248_s3 + $0xda8] sm:$0xff] }
 0x1a9   : > { %3767 = vmatprep.subr.mxu0 %v3148_v39  ;;  %3804 = vmatprep.subr.mxu1 %v3179_v40  ;;  %v3200_v38 = vld [vmem:[%s6248_s3 + $0xc30] sm:$0xff]  ;;  %v3231_v39 = vld [vmem:[%s6248_s3 + $0xd28] sm:$0xff] }
 0x1aa   : > { %3768 = vmatpush3.msra.mxu0 %v3132_v41  ;;  %3805 = vmatpush3.msra.mxu1 %v3163_v42  ;;  %v3215_v40 = vld [vmem:[%s6248_s3 + $0xca8] sm:$0xff]  ;;  %v3246_v41 = vld [vmem:[%s6248_s3 + $0xda0] sm:$0xff] }
 0x1ab   : > { %3769 = vmatprep.subr.mxu0 %v3147_v43  ;;  %3806 = vmatprep.subr.mxu1 %v3178_v44  ;;  %v3199_v42 = vld [vmem:[%s6248_s3 + $0xc28] sm:$0xff]  ;;  %v3230_v43 = vld [vmem:[%s6248_s3 + $0xd20] sm:$0xff] }
 0x1ac   : > { %3770 = vmatpush3.msra.mxu0 %v3131_v49  ;;  %3807 = vmatpush3.msra.mxu1 %v3162_v50  ;;  %v3214_v44 = vld [vmem:[%s6248_s3 + $0xca0] sm:$0xff]  ;;  %v3245_v49 = vld [vmem:[%s6248_s3 + $0xd98] sm:$0xff] }
 0x1ad   : > { %3771 = vmatprep.subr.mxu0 %v3146_v58  ;;  %2009 = vmatmul.mubr.f32.vlgmr.msra.gmra.mxu1 %v1940_v61  ;;  %v3198_v50 = vld [vmem:[%s6248_s3 + $0xc20] sm:$0xff]  ;;  %v3229_v58 = vld [vmem:[%s6248_s3 + $0xd18] sm:$0xff]  ;;  %v3244_v61 = vld [vmem:[%s6248_s3 + $0xd90] sm:$0xff] }
 0x1ae   : > { %3846 = vmatprep.subr.mxu1 %v3257_v60  ;;  %3772 = vmatpush3.msra.mxu0 %v3130_v62  ;;  %v3213_v60 = vld [vmem:[%s6248_s3 + $0xc98] sm:$0xff] }
 0x1af   : > { %3847 = vmatpush3.msra.mxu1 %v3241_v63  ;;  %2224 = vmatprep.mubr.f32.mxu1 %v2157_v1  ;;  %v3197_v62 = vld [vmem:[%s6248_s3 + $0xc18] sm:$0xff]  ;;  %v3228_v63 = vld [vmem:[%s6248_s3 + $0xd10] sm:$0xff] }
 0x1b0   : > { %1901 = vmatmul.mubr.f32.vlgmr.msra.gmra.mxu0 %v1832_v2  ;;  %3811 = vmatprep.subr.mxu0 %v3225_v3  ;;  %v3212_v1 = vld [vmem:[%s6248_s3 + $0xc90] sm:$0xff]  ;;  %v3243_v2 = vld [vmem:[%s6248_s3 + $0xd88] sm:$0xff] }
 0x1b1   : > { %3848 = vmatprep.subr.mxu1 %v3256_v46  ;;  %3812 = vmatpush3.msra.mxu0 %v3209_v53  ;;  %v3196_v3 = vld [vmem:[%s6248_s3 + $0xc10] sm:$0xff]  ;;  %v3227_v46 = vld [vmem:[%s6248_s3 + $0xd08] sm:$0xff] }
 0x1b2   : > { %2116 = vmatprep.mubr.f32.mxu0 %v2049_v54  ;;  %3849 = vmatpush3.msra.mxu1 %v3240_v5  ;;  %v3211_v53 = vld [vmem:[%s6248_s3 + $0xc88] sm:$0xff]  ;;  %v3242_v54 = vld [vmem:[%s6248_s3 + $0xd80] sm:$0xff] }
 0x1b3   : > { %3813 = vmatprep.subr.mxu0 %v3224_v6  ;;  %3850 = vmatprep.subr.mxu1 %v3255_v7  ;;  %v3195_v5 = vld [vmem:[%s6248_s3 + $0xc08] sm:$0xff]  ;;  %v3226_v6 = vld [vmem:[%s6248_s3 + $0xd00] sm:$0xff] }
 0x1b4   : > { %3814 = vmatpush3.msra.mxu0 %v3208_v8  ;;  %3851 = vmatpush3.msra.mxu1 %v3239_v24  ;;  %v3210_v7 = vld [vmem:[%s6248_s3 + $0xc80] sm:$0xff]  ;;  %v3321_v8 = vld [vmem:[%s6248_s3 + $0xff8] sm:$0xff]  ;;  %v2156_v24 = vrot.slane %v5345_v30, 5 }
 0x1b5   : > { %3815 = vmatprep.subr.mxu0 %v3223_v25  ;;  %3852 = vmatprep.subr.mxu1 %v3254_v10  ;;  %v3194_v25 = vld [vmem:[%s6248_s3 + $0xc00] sm:$0xff]  ;;  %v3305_v10 = vld [vmem:[%s6248_s3 + $0xf78] sm:$0xff] }
 0x1b6   : > { %3816 = vmatpush3.msra.mxu0 %v3207_v11  ;;  %3853 = vmatpush3.msra.mxu1 %v3238_v12  ;;  %v2373_v11 = vrot.slane %v5153_v17, 7  ;;  %v2048_v12 = vrot.slane %v5345_v30, 4 }
 0x1b7   : > { %3817 = vmatprep.subr.mxu0 %v3222_v13  ;;  %3854 = vmatprep.subr.mxu1 %v3253_v14  ;;  %v3289_v13 = vld [vmem:[%s6248_s3 + $0xef8] sm:$0xff]  ;;  %v3320_v14 = vld [vmem:[%s6248_s3 + $0xff0] sm:$0xff] }
 0x1b8   : > { %3818 = vmatpush3.msra.mxu0 %v3206_v15  ;;  %3855 = vmatpush3.msra.mxu1 %v3237_v16  ;;  %v3273_v15 = vld [vmem:[%s6248_s3 + $0xe78] sm:$0xff]  ;;  %v2265_v16 = vrot.slane %v5153_v17, 6  ;;  %v3303_v17 = vld [vmem:[%s6248_s3 + $0xf68] sm:$0xff] }
 0x1b9   : > { %3819 = vmatprep.subr.mxu0 %v3221_v45  ;;  %3856 = vmatprep.subr.mxu1 %v3252_v51  ;;  %v3304_v45 = vld [vmem:[%s6248_s3 + $0xf70] sm:$0xff] }
 0x1ba   : > { %3820 = vmatpush3.msra.mxu0 %v3205_v52  ;;  %3857 = vmatpush3.msra.mxu1 %v3236_v18  ;;  %v3288_v51 = vld [vmem:[%s6248_s3 + $0xef0] sm:$0xff]  ;;  %v3319_v52 = vld [vmem:[%s6248_s3 + $0xfe8] sm:$0xff] }
 0x1bb   : > { %3821 = vmatprep.subr.mxu0 %v3220_v19  ;;  %3858 = vmatprep.subr.mxu1 %v3251_v20  ;;  %v3272_v18 = vld [vmem:[%s6248_s3 + $0xe70] sm:$0xff]  ;;  %v3287_v19 = vld [vmem:[%s6248_s3 + $0xee8] sm:$0xff]  ;;  %v3318_v20 = vld [vmem:[%s6248_s3 + $0xfe0] sm:$0xff] }
 0x1bc   : > { %3822 = vmatpush3.msra.mxu0 %v3204_v21  ;;  %3859 = vmatpush3.msra.mxu1 %v3235_v22  ;;  %v3271_v21 = vld [vmem:[%s6248_s3 + $0xe68] sm:$0xff]  ;;  %v3302_v22 = vld [vmem:[%s6248_s3 + $0xf60] sm:$0xff] }
 0x1bd   : > { %3823 = vmatprep.subr.mxu0 %v3219_v23  ;;  %3860 = vmatprep.subr.mxu1 %v3250_v4  ;;  %v3286_v23 = vld [vmem:[%s6248_s3 + $0xee0] sm:$0xff]  ;;  %v3317_v4 = vld [vmem:[%s6248_s3 + $0xfd8] sm:$0xff] }
 0x1be   : > { %3824 = vmatpush3.msra.mxu0 %v3203_v26  ;;  %3861 = vmatpush3.msra.mxu1 %v3234_v27  ;;  %v3270_v26 = vld [vmem:[%s6248_s3 + $0xe60] sm:$0xff]  ;;  %v3301_v27 = vld [vmem:[%s6248_s3 + $0xf58] sm:$0xff] }
 0x1bf   : > { %3825 = vmatprep.subr.mxu0 %v3218_v28  ;;  %3862 = vmatprep.subr.mxu1 %v3249_v29  ;;  %v3285_v28 = vld [vmem:[%s6248_s3 + $0xed8] sm:$0xff]  ;;  %v3316_v29 = vld [vmem:[%s6248_s3 + $0xfd0] sm:$0xff] }
 0x1c0   : > { %3826 = vmatpush3.msra.mxu0 %v3202_v9  ;;  %3863 = vmatpush3.msra.mxu1 %v3233_v31  ;;  %v3269_v9 = vld [vmem:[%s6248_s3 + $0xe58] sm:$0xff]  ;;  %v3300_v31 = vld [vmem:[%s6248_s3 + $0xf50] sm:$0xff] }
 0x1c1   : > { %3827 = vmatprep.subr.mxu0 %v3217_v32  ;;  %3864 = vmatprep.subr.mxu1 %v3248_v33  ;;  %v3284_v32 = vld [vmem:[%s6248_s3 + $0xed0] sm:$0xff]  ;;  %v5833_v33 = vpop.f32.mrf.mxu0 }
 0x1c2   : > { %3828 = vmatpush3.msra.mxu0 %v3201_v34  ;;  %3865 = vmatpush3.msra.mxu1 %v3232_v35  ;;  %v5835_v34 = vpop.f32.mrf.mxu1  ;;  %v3315_v35 = vld [vmem:[%s6248_s3 + $0xfc8] sm:$0xff] }
 0x1c3   : > { %3829 = vmatprep.subr.mxu0 %v3216_v36  ;;  %3866 = vmatprep.subr.mxu1 %v3247_v37  ;;  %v3268_v36 = vld [vmem:[%s6248_s3 + $0xe50] sm:$0xff]  ;;  %v3299_v37 = vld [vmem:[%s6248_s3 + $0xf48] sm:$0xff] }
 0x1c4   : > { %3830 = vmatpush3.msra.mxu0 %v3200_v38  ;;  %3867 = vmatpush3.msra.mxu1 %v3231_v39  ;;  %v3283_v38 = vld [vmem:[%s6248_s3 + $0xec8] sm:$0xff]  ;;  %v3314_v39 = vld [vmem:[%s6248_s3 + $0xfc0] sm:$0xff] }
 0x1c5   : > { %3831 = vmatprep.subr.mxu0 %v3215_v40  ;;  %3868 = vmatprep.subr.mxu1 %v3246_v41  ;;  %v3267_v40 = vld [vmem:[%s6248_s3 + $0xe48] sm:$0xff]  ;;  %v3298_v41 = vld [vmem:[%s6248_s3 + $0xf40] sm:$0xff] }
 0x1c6   : > { %3832 = vmatpush3.msra.mxu0 %v3199_v42  ;;  %3869 = vmatpush3.msra.mxu1 %v3230_v43  ;;  %v3282_v42 = vld [vmem:[%s6248_s3 + $0xec0] sm:$0xff]  ;;  %v592_v43 = vpop.f32.mrf.mxu0 }
 0x1c7   : > { %3833 = vmatprep.subr.mxu0 %v3214_v44  ;;  %3870 = vmatprep.subr.mxu1 %v3245_v49  ;;  %v675_v44 = vpop.f32.mrf.mxu1  ;;  %v3313_v49 = vld [vmem:[%s6248_s3 + $0xfb8] sm:$0xff] }
 0x1c8   : > { %3834 = vmatpush3.msra.mxu0 %v3198_v50  ;;  %3871 = vmatpush3.msra.mxu1 %v3229_v58  ;;  %v3266_v50 = vld [vmem:[%s6248_s3 + $0xe40] sm:$0xff]  ;;  %v3297_v58 = vld [vmem:[%s6248_s3 + $0xf38] sm:$0xff] }
 0x1c9   : > { %3835 = vmatprep.subr.mxu0 %v3213_v60  ;;  %3872 = vmatprep.subr.mxu1 %v3244_v61  ;;  %v3281_v60 = vld [vmem:[%s6248_s3 + $0xeb8] sm:$0xff]  ;;  %v3312_v61 = vld [vmem:[%s6248_s3 + $0xfb0] sm:$0xff] }
 0x1ca   : > { %3836 = vmatpush3.msra.mxu0 %v3197_v62  ;;  %3873 = vmatpush3.msra.mxu1 %v3228_v63  ;;  %v3265_v62 = vld [vmem:[%s6248_s3 + $0xe38] sm:$0xff]  ;;  %v689_v63 = vmax.f32 %v592_v43, %v675_v44  ;;  %v3334_v44 = vld [vmem:[%s6248_s3 + $0x1060] sm:$0xff] }
 0x1cb   : > { %3837 = vmatprep.subr.mxu0 %v3212_v1  ;;  %3874 = vmatprep.subr.mxu1 %v3243_v2  ;;  %v3296_v1 = vld [vmem:[%s6248_s3 + $0xf30] sm:$0xff]  ;;  %v3381_v43 = vld [vmem:[%s6248_s3 + $0x11d8] sm:$0xff] }
 0x1cc   : > { %3838 = vmatpush3.msra.mxu0 %v3196_v3  ;;  %3875 = vmatpush3.msra.mxu1 %v3227_v46  ;;  %v3280_v2 = vld [vmem:[%s6248_s3 + $0xeb0] sm:$0xff]  ;;  %v3311_v3 = vld [vmem:[%s6248_s3 + $0xfa8] sm:$0xff] }
 0x1cd   : > { %3839 = vmatprep.subr.mxu0 %v3211_v53  ;;  %3876 = vmatprep.subr.mxu1 %v3242_v54  ;;  %v3264_v46 = vld [vmem:[%s6248_s3 + $0xe30] sm:$0xff]  ;;  %v3295_v53 = vld [vmem:[%s6248_s3 + $0xf28] sm:$0xff] }
 0x1ce   : > { %3840 = vmatpush3.msra.mxu0 %v3195_v5  ;;  %3877 = vmatpush3.msra.mxu1 %v3226_v6  ;;  %v3279_v54 = vld [vmem:[%s6248_s3 + $0xea8] sm:$0xff]  ;;  %v3310_v5 = vld [vmem:[%s6248_s3 + $0xfa0] sm:$0xff] }
 0x1cf   : > { %3841 = vmatprep.subr.mxu0 %v3210_v7  ;;  %2225 = vmatmul.mubr.f32.vlgmr.msra.gmra.mxu1 %v2156_v24  ;;  %v3263_v6 = vld [vmem:[%s6248_s3 + $0xe28] sm:$0xff]  ;;  %v695_v7 = vmax.f32 %v683_v59, %v689_v63  ;;  %v3278_v24 = vld [vmem:[%s6248_s3 + $0xea0] sm:$0xff]  ;;  %v3277_v59 = vld [vmem:[%s6248_s3 + $0xe98] sm:$0xff] }
 0x1d0   : > { %3916 = vmatprep.subr.mxu1 %v3321_v8  ;;  %3842 = vmatpush3.msra.mxu0 %v3194_v25  ;;  %v3294_v8 = vld [vmem:[%s6248_s3 + $0xf20] sm:$0xff]  ;;  %v3309_v25 = vld [vmem:[%s6248_s3 + $0xf98] sm:$0xff]  ;;  %v3379_v63 = vld [vmem:[%s6248_s3 + $0x11c8] sm:$0xff] }
 0x1d1   : > { %3917 = vmatpush3.msra.mxu1 %v3305_v10  ;;  %2440 = vmatprep.mubr.f32.mxu1 %v2373_v11  ;;  %v5924_v10 = vpop.permute.xlu1 %711  ;;  %v3308_v11 = vld [vmem:[%s6248_s3 + $0xf90] sm:$0xff] }
 0x1d2   : > { %2117 = vmatmul.mubr.f32.vlgmr.msra.gmra.mxu0 %v2048_v12  ;;  %3881 = vmatprep.subr.mxu0 %v3289_v13  ;;  %v3261_v12 = vld [vmem:[%s6248_s3 + $0xe18] sm:$0xff]  ;;  %v719_v13 = vadd.f32 %v5924_v10, %v695_v7  ;;  %v3330_v7 = vld [vmem:[%s6248_s3 + $0x1040] sm:$0xff] }
 0x1d3   : > { %3918 = vmatprep.subr.mxu1 %v3320_v14  ;;  %3882 = vmatpush3.msra.mxu0 %v3273_v15  ;;  %v3292_v14 = vld [vmem:[%s6248_s3 + $0xf10] sm:$0xff] }
 0x1d4   : > { %2332 = vmatprep.mubr.f32.mxu0 %v2265_v16  ;;  %3919 = vmatpush3.msra.mxu1 %v3304_v45  ;;  %v3276_v15 = vld [vmem:[%s6248_s3 + $0xe90] sm:$0xff]  ;;  %v3307_v16 = vld [vmem:[%s6248_s3 + $0xf88] sm:$0xff] }
 0x1d5   : > { %3883 = vmatprep.subr.mxu0 %v3288_v51  ;;  %3920 = vmatprep.subr.mxu1 %v3319_v52  ;;  %v3260_v45 = vld [vmem:[%s6248_s3 + $0xe10] sm:$0xff]  ;;  %v3291_v51 = vld [vmem:[%s6248_s3 + $0xf08] sm:$0xff] }
 0x1d6   : > { %3884 = vmatpush3.msra.mxu0 %v3272_v18  ;;  %3921 = vmatpush3.msra.mxu1 %v3303_v17  ;;  %v3275_v52 = vld [vmem:[%s6248_s3 + $0xe88] sm:$0xff]  ;;  %v3306_v18 = vld [vmem:[%s6248_s3 + $0xf80] sm:$0xff] }
 0x1d7   : > { %3885 = vmatprep.subr.mxu0 %v3287_v19  ;;  %3922 = vmatprep.subr.mxu1 %v3318_v20  ;;  %v3259_v17 = vld [vmem:[%s6248_s3 + $0xe08] sm:$0xff]  ;;  %v725_v19 = vmax.f32 %v719_v13, 0.0  ;;  %v3290_v20 = vld [vmem:[%s6248_s3 + $0xf00] sm:$0xff] }
 0x1d8   : > { %3886 = vmatpush3.msra.mxu0 %v3271_v21  ;;  %3923 = vmatpush3.msra.mxu1 %v3302_v22  ;;  %v3274_v21 = vld [vmem:[%s6248_s3 + $0xe80] sm:$0xff]  ;;  %v3385_v22 = vld [vmem:[%s6248_s3 + $0x11f8] sm:$0xff]  ;;  %v3359_v13 = vld [vmem:[%s6248_s3 + $0x1128] sm:$0xff] }
 0x1d9   : > { %3887 = vmatprep.subr.mxu0 %v3286_v23  ;;  %3924 = vmatprep.subr.mxu1 %v3317_v4  ;;  %v2372_v23 = vrot.slane %v5345_v30, 7  ;;  %v3258_v4 = vld [vmem:[%s6248_s3 + $0xe00] sm:$0xff] }
 0x1da   : > { %3888 = vmatpush3.msra.mxu0 %v3270_v26  ;;  %3925 = vmatpush3.msra.mxu1 %v3301_v27  ;;  %v3369_v26 = vld [vmem:[%s6248_s3 + $0x1178] sm:$0xff]  ;;  %v2587_v27 = vrot.slane %v725_v19, 1 }
 0x1db   : > { %3889 = vmatprep.subr.mxu0 %v3285_v28  ;;  %3926 = vmatprep.subr.mxu1 %v3316_v29  ;;  %v2264_v28 = vrot.slane %v5345_v30, 6  ;;  %v3353_v29 = vld [vmem:[%s6248_s3 + $0x10f8] sm:$0xff]  ;;  %v3368_v30 = vld [vmem:[%s6248_s3 + $0x1170] sm:$0xff] }
 0x1dc   : > { %3890 = vmatpush3.msra.mxu0 %v3269_v9  ;;  %3927 = vmatpush3.msra.mxu1 %v3300_v31  ;;  %v3384_v9 = vld [vmem:[%s6248_s3 + $0x11f0] sm:$0xff]  ;;  %v3337_v31 = vld [vmem:[%s6248_s3 + $0x1078] sm:$0xff] }
 0x1dd   : > { %3891 = vmatprep.subr.mxu0 %v3284_v32  ;;  %3928 = vmatprep.subr.mxu1 %v3315_v35  ;;  %v3352_v32 = vld [vmem:[%s6248_s3 + $0x10f0] sm:$0xff]  ;;  %v3383_v35 = vld [vmem:[%s6248_s3 + $0x11e8] sm:$0xff] }
 0x1de   : > { %3892 = vmatpush3.msra.mxu0 %v3268_v36  ;;  %3929 = vmatpush3.msra.mxu1 %v3299_v37  ;;  %v3336_v36 = vld [vmem:[%s6248_s3 + $0x1070] sm:$0xff]  ;;  %v3367_v37 = vld [vmem:[%s6248_s3 + $0x1168] sm:$0xff] }
 0x1df   : > { %3893 = vmatprep.subr.mxu0 %v3283_v38  ;;  %3930 = vmatprep.subr.mxu1 %v3314_v39  ;;  %v3351_v38 = vld [vmem:[%s6248_s3 + $0x10e8] sm:$0xff]  ;;  %v3382_v39 = vld [vmem:[%s6248_s3 + $0x11e0] sm:$0xff] }
 0x1e0   : > { %3894 = vmatpush3.msra.mxu0 %v3267_v40  ;;  %3931 = vmatpush3.msra.mxu1 %v3298_v41  ;;  %v3335_v40 = vld [vmem:[%s6248_s3 + $0x1068] sm:$0xff]  ;;  %v3366_v41 = vld [vmem:[%s6248_s3 + $0x1160] sm:$0xff] }
 0x1e1   : > { %3895 = vmatprep.subr.mxu0 %v3282_v42  ;;  %3932 = vmatprep.subr.mxu1 %v3313_v49  ;;  %v3350_v42 = vld [vmem:[%s6248_s3 + $0x10e0] sm:$0xff]  ;;  %v3365_v49 = vld [vmem:[%s6248_s3 + $0x1158] sm:$0xff] }
 0x1e2   : > { %3896 = vmatpush3.msra.mxu0 %v3266_v50  ;;  %3933 = vmatpush3.msra.mxu1 %v3297_v58  ;;  %v3349_v50 = vld [vmem:[%s6248_s3 + $0x10d8] sm:$0xff]  ;;  %v3380_v58 = vld [vmem:[%s6248_s3 + $0x11d0] sm:$0xff] }
 0x1e3   : > { %3897 = vmatprep.subr.mxu0 %v3281_v60  ;;  %3934 = vmatprep.subr.mxu1 %v3312_v61  ;;  %v3333_v60 = vld [vmem:[%s6248_s3 + $0x1058] sm:$0xff]  ;;  %v3364_v61 = vld [vmem:[%s6248_s3 + $0x1150] sm:$0xff] }
 0x1e4   : > { %3898 = vmatpush3.msra.mxu0 %v3265_v62  ;;  %3935 = vmatpush3.msra.mxu1 %v3296_v1  ;;  %v3348_v62 = vld [vmem:[%s6248_s3 + $0x10d0] sm:$0xff] }
 0x1e5   : > { %3899 = vmatprep.subr.mxu0 %v3280_v2  ;;  %3936 = vmatprep.subr.mxu1 %v3311_v3  ;;  %v3332_v1 = vld [vmem:[%s6248_s3 + $0x1050] sm:$0xff]  ;;  %v3363_v2 = vld [vmem:[%s6248_s3 + $0x1148] sm:$0xff] }
 0x1e6   : > { %3900 = vmatpush3.msra.mxu0 %v3264_v46  ;;  %3937 = vmatpush3.msra.mxu1 %v3295_v53  ;;  %v3347_v3 = vld [vmem:[%s6248_s3 + $0x10c8] sm:$0xff]  ;;  %v3378_v46 = vld [vmem:[%s6248_s3 + $0x11c0] sm:$0xff] }
 0x1e7   : > { %3901 = vmatprep.subr.mxu0 %v3279_v54  ;;  %3938 = vmatprep.subr.mxu1 %v3310_v5  ;;  %v3331_v53 = vld [vmem:[%s6248_s3 + $0x1048] sm:$0xff]  ;;  %v3362_v54 = vld [vmem:[%s6248_s3 + $0x1140] sm:$0xff] }
 0x1e8   : > { %3902 = vmatpush3.msra.mxu0 %v3263_v6  ;;  %3939 = vmatpush3.msra.mxu1 %v3294_v8  ;;  %v3346_v5 = vld [vmem:[%s6248_s3 + $0x10c0] sm:$0xff]  ;;  %v3377_v6 = vld [vmem:[%s6248_s3 + $0x11b8] sm:$0xff]  ;;  %v688_v8 = vmax.f32 %v5833_v33, %v5835_v34  ;;  %v3360_v34 = vld [vmem:[%s6248_s3 + $0x1130] sm:$0xff] }
 0x1e9   : > { %3903 = vmatprep.subr.mxu0 %v3278_v24  ;;  %3940 = vmatprep.subr.mxu1 %v3309_v25  ;;  %v3361_v24 = vld [vmem:[%s6248_s3 + $0x1138] sm:$0xff] }
 0x1ea   : > { %3904 = vmatpush3.msra.mxu0 %v3262_v48  ;;  %3941 = vmatpush3.msra.mxu1 %v3293_v57  ;;  %v3345_v25 = vld [vmem:[%s6248_s3 + $0x10b8] sm:$0xff]  ;;  %v3376_v48 = vld [vmem:[%s6248_s3 + $0x11b0] sm:$0xff] }
 0x1eb   : > { %3905 = vmatprep.subr.mxu0 %v3277_v59  ;;  %3942 = vmatprep.subr.mxu1 %v3308_v11  ;;  %v3329_v33 = vld [vmem:[%s6248_s3 + $0x1038] sm:$0xff]  ;;  %v3344_v57 = vld [vmem:[%s6248_s3 + $0x10b0] sm:$0xff]  ;;  %v3375_v59 = vld [vmem:[%s6248_s3 + $0x11a8] sm:$0xff] }
 0x1ec   : > { %3906 = vmatpush3.msra.mxu0 %v3261_v12  ;;  %3943 = vmatpush3.msra.mxu1 %v3292_v14  ;;  %v3328_v11 = vld [vmem:[%s6248_s3 + $0x1030] sm:$0xff]  ;;  %v694_v12 = vmax.f32 %v682_v56, %v688_v8  ;;  %v3343_v14 = vld [vmem:[%s6248_s3 + $0x10a8] sm:$0xff]  ;;  %v3342_v56 = vld [vmem:[%s6248_s3 + $0x10a0] sm:$0xff] }
 0x1ed   : > { %3907 = vmatprep.subr.mxu0 %v3276_v15  ;;  %3944 = vmatprep.subr.mxu1 %v3307_v16  ;;  %v3374_v15 = vld [vmem:[%s6248_s3 + $0x11a0] sm:$0xff]  ;;  %v3373_v16 = vld [vmem:[%s6248_s3 + $0x1198] sm:$0xff] }
 0x1ee   : > { %3908 = vmatpush3.msra.mxu0 %v3260_v45  ;;  %3945 = vmatpush3.msra.mxu1 %v3291_v51  ;;  %v3326_v45 = vld [vmem:[%s6248_s3 + $0x1020] sm:$0xff]  ;;  %v718_v51 = vadd.f32 %v5924_v10, %v694_v12  ;;  %v3325_v10 = vld [vmem:[%s6248_s3 + $0x1018] sm:$0xff] }
 0x1ef   : > { %3909 = vmatprep.subr.mxu0 %v3275_v52  ;;  %3946 = vmatprep.subr.mxu1 %v3306_v18  ;;  %v3357_v52 = vld [vmem:[%s6248_s3 + $0x1118] sm:$0xff] }
 0x1f0   : > { %3910 = vmatpush3.msra.mxu0 %v3259_v17  ;;  %3947 = vmatpush3.msra.mxu1 %v3290_v20  ;;  %v3341_v18 = vld [vmem:[%s6248_s3 + $0x1098] sm:$0xff]  ;;  %v3372_v17 = vld [vmem:[%s6248_s3 + $0x1190] sm:$0xff] }
 0x1f1   : > { %3911 = vmatprep.subr.mxu0 %v3274_v21  ;;  %2441 = vmatmul.mubr.f32.vlgmr.msra.gmra.mxu1 %v2372_v23  ;;  %v3340_v20 = vld [vmem:[%s6248_s3 + $0x1090] sm:$0xff]  ;;  %v3371_v21 = vld [vmem:[%s6248_s3 + $0x1188] sm:$0xff]  ;;  %v724_v23 = vmax.f32 %v718_v51, 0.0 }
 0x1f2   : > { %3986 = vmatprep.subr.mxu1 %v3385_v22  ;;  %3912 = vmatpush3.msra.mxu0 %v3258_v4  ;;  %v3324_v22 = vld [vmem:[%s6248_s3 + $0x1010] sm:$0xff]  ;;  %v3355_v4 = vld [vmem:[%s6248_s3 + $0x1108] sm:$0xff] }
 0x1f3   : > { %3987 = vmatpush3.msra.mxu1 %v3369_v26  ;;  %2654 = vmatprep.mubr.f32.mxu1 %v2587_v27  ;;  %v3339_v26 = vld [vmem:[%s6248_s3 + $0x1088] sm:$0xff]  ;;  %v3370_v27 = vld [vmem:[%s6248_s3 + $0x1180] sm:$0xff] }
 0x1f4   : > { %2333 = vmatmul.mubr.f32.vlgmr.msra.gmra.mxu0 %v2264_v28  ;;  %3951 = vmatprep.subr.mxu0 %v3353_v29  ;;  %v3323_v28 = vld [vmem:[%s6248_s3 + $0x1008] sm:$0xff]  ;;  %v3354_v29 = vld [vmem:[%s6248_s3 + $0x1100] sm:$0xff] }
 0x1f5   : > { %3988 = vmatprep.subr.mxu1 %v3384_v9  ;;  %3952 = vmatpush3.msra.mxu0 %v3337_v31  ;;  %v3338_v9 = vld [vmem:[%s6248_s3 + $0x1080] sm:$0xff] }
 0x1f6   : > { %2544 = vmatprep.mubr.f32.mxu0 %v725_v19  ;;  %3989 = vmatpush3.msra.mxu1 %v3368_v30  ;;  %v3356_v19 = vld [vmem:[%s6248_s3 + $0x1110] sm:$0xff]  ;;  %v3322_v31 = vld [vmem:[%s6248_s3 + $0x1000] sm:$0xff]  ;;  %v2586_v30 = vrot.slane %v724_v23, 1 }
 0x1f7   : > { %3953 = vmatprep.subr.mxu0 %v3352_v32  ;;  %3990 = vmatprep.subr.mxu1 %v3383_v35  ;;  %v2671_v32 = vld [vmem:[%s6250_s5 + $0x38] sm:$0xff]  ;;  %v2670_v35 = vld [vmem:[%s6250_s5 + $0x30] sm:$0xff] }
 0x1f8   : > { %3954 = vmatpush3.msra.mxu0 %v3336_v36  ;;  %3991 = vmatpush3.msra.mxu1 %v3367_v37  ;;  %v2669_v36 = vld [vmem:[%s6250_s5 + $0x28] sm:$0xff]  ;;  %v2668_v37 = vld [vmem:[%s6250_s5 + $0x20] sm:$0xff] }
 0x1f9   : > { %3955 = vmatprep.subr.mxu0 %v3351_v38  ;;  %3992 = vmatprep.subr.mxu1 %v3382_v39  ;;  %v2667_v38 = vld [vmem:[%s6250_s5 + $0x18] sm:$0xff]  ;;  %v2666_v39 = vld [vmem:[%s6250_s5 + $0x10] sm:$0xff] }
 0x1fa   : > { %3956 = vmatpush3.msra.mxu0 %v3335_v40  ;;  %3993 = vmatpush3.msra.mxu1 %v3366_v41  ;;  %v2665_v40 = vld [vmem:[%s6250_s5 + $0x8] sm:$0xff]  ;;  %v2664_v41 = vld [vmem:[%s6250_s5] sm:$0xff] }
 0x1fb   : > { %3957 = vmatprep.subr.mxu0 %v3350_v42  ;;  %3994 = vmatprep.subr.mxu1 %v3381_v43  ;;  %v3423_v42 = vpop.f32.mrf.mxu0 }
 0x1fc   : > { %3958 = vmatpush3.msra.mxu0 %v3334_v44  ;;  %3995 = vmatpush3.msra.mxu1 %v3365_v49  ;;  %v3458_v44 = vpop.f32.mrf.mxu1 }
 0x1fd   : > { %3959 = vmatprep.subr.mxu0 %v3349_v50  ;;  %3996 = vmatprep.subr.mxu1 %v3380_v58  ;;  %v3424_v43 = vpop.f32.mrf.mxu0 }
 0x1fe   : > { %3960 = vmatpush3.msra.mxu0 %v3333_v60  ;;  %3997 = vmatpush3.msra.mxu1 %v3364_v61  ;;  %v3459_v50 = vpop.f32.mrf.mxu1  ;;  %v3425_v60 = vadd.f32 %v3424_v43, %v3423_v42 }
 0x1ff   : > { %3961 = vmatprep.subr.mxu0 %v3348_v62  ;;  %3998 = vmatprep.subr.mxu1 %v3379_v63  ;;  %v3493_v49 = vpop.f32.mrf.mxu0  ;;  %v3460_v63 = vadd.f32 %v3459_v50, %v3458_v44 }
 0x200   : > { %3962 = vmatpush3.msra.mxu0 %v3332_v1  ;;  %3999 = vmatpush3.msra.mxu1 %v3363_v2  ;;  %v3528_v61 = vpop.f32.mrf.mxu1 }
 0x201   : > { %3963 = vmatprep.subr.mxu0 %v3347_v3  ;;  %4000 = vmatprep.subr.mxu1 %v3378_v46  ;;  %v3494_v58 = vpop.f32.mrf.mxu0  ;;  %v934_v2 = vadd.f32 %v3460_v63, %v3425_v60  ;;  %v2661_v60 = vld [vmem:[%s6249_s4] sm:$0x1] }
 0x202   : > { %3964 = vmatpush3.msra.mxu0 %v3331_v53  ;;  %4001 = vmatpush3.msra.mxu1 %v3362_v54  ;;  %v3495_v1 = vadd.f32 %v3494_v58, %v3493_v49  ;;  %v3529_v3 = vpop.f32.mrf.mxu1 }
 0x203   : > { %3965 = vmatprep.subr.mxu0 %v3346_v5  ;;  %4002 = vmatprep.subr.mxu1 %v3377_v6  ;;  %v3530_v6 = vadd.f32 %v3529_v3, %v3528_v61 }
 0x204   : > { %3966 = vmatpush3.msra.mxu0 %v3330_v7  ;;  %4003 = vmatpush3.msra.mxu1 %v3361_v24  ;;  %v1044_v53 = vadd.f32 %v3495_v1, %v934_v2  ;;  %v2672_v1 = vld [vmem:[%s6251_s6] sm:$0x1] }
 0x205   : > { %3967 = vmatprep.subr.mxu0 %v3345_v25  ;;  %4004 = vmatprep.subr.mxu1 %v3376_v48 }
 0x206   : > { %3968 = vmatpush3.msra.mxu0 %v3329_v33  ;;  %4005 = vmatpush3.msra.mxu1 %v3360_v34  ;;  %v1152_v8 = vadd.f32 %v3530_v6, %v1044_v53 }
 0x207   : > { %3969 = vmatprep.subr.mxu0 %v3344_v57  ;;  %4006 = vmatprep.subr.mxu1 %v3375_v59  ;;  %v3598_v54 = vpop.f32.mrf.mxu1 }
 0x208   : > { %3970 = vmatpush3.msra.mxu0 %v3328_v11  ;;  %4007 = vmatpush3.msra.mxu1 %v3359_v13 }
 0x209   : > { %3971 = vmatprep.subr.mxu0 %v3343_v14  ;;  %4008 = vmatprep.subr.mxu1 %v3374_v15  ;;  %v3599_v7 = vpop.f32.mrf.mxu1 }
 0x20a   : > { %3972 = vmatpush3.msra.mxu0 %v3327_v47  ;;  %4009 = vmatpush3.msra.mxu1 %v3358_v55  ;;  %v3563_v62 = vpop.f32.mrf.mxu0  ;;  %v3600_v34 = vadd.f32 %v3599_v7, %v3598_v54 }
 0x20b   : > { %3973 = vmatprep.subr.mxu0 %v3342_v56  ;;  %4010 = vmatprep.subr.mxu1 %v3373_v16 }
 0x20c   : > { %3974 = vmatpush3.msra.mxu0 %v3326_v45  ;;  %4011 = vmatpush3.msra.mxu1 %v3357_v52  ;;  %v3564_v46 = vpop.f32.mrf.mxu0 }
 0x20d   : > { %3975 = vmatprep.subr.mxu0 %v3341_v18  ;;  %4012 = vmatprep.subr.mxu1 %v3372_v17 }
 0x20e   : > { %3976 = vmatpush3.msra.mxu0 %v3325_v10  ;;  %4013 = vmatpush3.msra.mxu1 %v3356_v19 }
 0x20f   : > { %3977 = vmatprep.subr.mxu0 %v3340_v20  ;;  %4014 = vmatprep.subr.mxu1 %v3371_v21 }
 0x210   : > { %3978 = vmatpush3.msra.mxu0 %v3324_v22  ;;  %4015 = vmatpush3.msra.mxu1 %v3355_v4 }
 0x211   : > { %3979 = vmatprep.subr.mxu0 %v3339_v26  ;;  %4016 = vmatprep.subr.mxu1 %v3370_v27 }
 0x212   : > { %3980 = vmatpush3.msra.mxu0 %v3323_v28  ;;  %4017 = vmatpush3.msra.mxu1 %v3354_v29 }
 0x213   : > { %3981 = vmatprep.subr.mxu0 %v3338_v9  ;;  %2655 = vmatmul.mubr.f32.vlgmr.msra.gmra.mxu1 %v2586_v30 }
 0x214   : > { %3982 = vmatpush3.msra.mxu0 %v3322_v31 }
 0x215   : > { %2545 = vmatmul.mubr.f32.vlgmr.msra.gmra.mxu0 %v724_v23  ;;  %4030 = vmatprep.subr.mxu0 %v4155_v0 }
 0x216   : > { %4031 = vmatpush3.msra.mxu0 %v2671_v32  ;;  %4046 = vmatprep.mubr.msk.f32.mxu0 %vm4157_vm2, %v4155_v0 }
 0x217   : > { %4032 = vmatprep.subr.mxu0 %v4155_v0 }
 0x218   : > { %4033 = vmatpush3.msra.mxu0 %v2670_v35 }
 0x219   : > { %4034 = vmatprep.subr.mxu0 %v4155_v0 }
 0x21a   : > { %4035 = vmatpush3.msra.mxu0 %v2669_v36 }
 0x21b   : > { %4036 = vmatprep.subr.mxu0 %v4155_v0 }
 0x21c   : > { %4037 = vmatpush3.msra.mxu0 %v2668_v37 }
 0x21d   : > { %4038 = vmatprep.subr.mxu0 %v4155_v0 }
 0x21e   : > { %4039 = vmatpush3.msra.mxu0 %v2667_v38 }
 0x21f   : > { %4040 = vmatprep.subr.mxu0 %v4155_v0 }
 0x220   : > { %4041 = vmatpush3.msra.mxu0 %v2666_v39 }
 0x221   : > { %4042 = vmatprep.subr.mxu0 %v4155_v0 }
 0x222   : > { %4043 = vmatpush3.msra.mxu0 %v2665_v40 }
 0x223   : > { %4044 = vmatprep.subr.mxu0 %v4155_v0  ;;  %v3565_v0 = vadd.f32 %v3564_v46, %v3563_v62 }
 0x224   : > { %4045 = vmatpush3.msra.mxu0 %v2664_v41 }
 0x225   : > { %v1260_v25 = vadd.f32 %v3565_v0, %v1152_v8 }
 0x227   : > { %v1368_v11 = vadd.f32 %v3600_v34, %v1260_v25 }
 0x229   : > { %v3668_v48 = vpop.f32.mrf.mxu1 }
 0x22b   : > { %v3669_v59 = vpop.f32.mrf.mxu1 }
 0x22c   : > { %v3633_v5 = vpop.f32.mrf.mxu0  ;;  %v3670_v47 = vadd.f32 %v3669_v59, %v3668_v48 }
 0x22e   : > { %v3634_v24 = vpop.f32.mrf.mxu0 }
 0x22f   : > { %v3635_v57 = vadd.f32 %v3634_v24, %v3633_v5 }
 0x231   : > { %v1476_v13 = vadd.f32 %v3635_v57, %v1368_v11 }
 0x233   : > { %v1584_v16 = vadd.f32 %v3670_v47, %v1476_v13 }
 0x24b   : > { %v3738_v14 = vpop.f32.mrf.mxu1 }
 0x24d   : > { %v3739_v56 = vpop.f32.mrf.mxu1 }
 0x24e   : > { %v3703_v33 = vpop.f32.mrf.mxu0  ;;  %v3740_v17 = vadd.f32 %v3739_v56, %v3738_v14 }
 0x250   : > { %v3704_v12 = vpop.f32.mrf.mxu0 }
 0x251   : > { %v3705_v55 = vadd.f32 %v3704_v12, %v3703_v33 }
 0x253   : > { %v1688_v51 = vadd.f32 %v3705_v55, %v1584_v16 }
 0x255   : > { %v1798_v20 = vadd.f32 %v3740_v17, %v1688_v51 }
 0x26d   : > { %v3808_v52 = vpop.f32.mrf.mxu1 }
 0x26f   : > { %v3809_v19 = vpop.f32.mrf.mxu1 }
 0x270   : > { %v3773_v15 = vpop.f32.mrf.mxu0  ;;  %v3810_v26 = vadd.f32 %v3809_v19, %v3808_v52 }
 0x272   : > { %v3774_v45 = vpop.f32.mrf.mxu0 }
 0x273   : > { %v3775_v10 = vadd.f32 %v3774_v45, %v3773_v15 }
 0x275   : > { %v1906_v22 = vadd.f32 %v3775_v10, %v1798_v20 }
 0x277   : > { %v2014_v29 = vadd.f32 %v3810_v26, %v1906_v22 }
 0x28f   : > { %v3878_v23 = vpop.f32.mrf.mxu1 }
 0x291   : > { %v3879_v28 = vpop.f32.mrf.mxu1 }
 0x292   : > { %v3843_v18 = vpop.f32.mrf.mxu0  ;;  %v3880_v32 = vadd.f32 %v3879_v28, %v3878_v23 }
 0x294   : > { %v3844_v21 = vpop.f32.mrf.mxu0 }
 0x295   : > { %v3845_v27 = vadd.f32 %v3844_v21, %v3843_v18 }
 0x297   : > { %v2122_v31 = vadd.f32 %v3845_v27, %v2014_v29 }
 0x299   : > { %v2230_v37 = vadd.f32 %v3880_v32, %v2122_v31 }
 0x2b1   : > { %v3948_v30 = vpop.f32.mrf.mxu1 }
 0x2b3   : > { %v3949_v36 = vpop.f32.mrf.mxu1 }
 0x2b4   : > { %v3913_v4 = vpop.f32.mrf.mxu0  ;;  %v3950_v41 = vadd.f32 %v3949_v36, %v3948_v30 }
 0x2b6   : > { %v3914_v9 = vpop.f32.mrf.mxu0 }
 0x2b7   : > { %v3915_v35 = vadd.f32 %v3914_v9, %v3913_v4 }
 0x2b9   : > { %v2338_v38 = vadd.f32 %v3915_v35, %v2230_v37 }
 0x2bb   : > { %v2446_v44 = vadd.f32 %v3950_v41, %v2338_v38 }
 0x2d3   : > { %v4018_v39 = vpop.f32.mrf.mxu1 }
 0x2d5   : > { %v3983_v40 = vpop.f32.mrf.mxu0  ;;  %v4019_v42 = vpop.f32.mrf.mxu1 }
 0x2d6   : > { %v4020_v50 = vadd.f32 %v4019_v42, %v4018_v39 }
 0x2d7   : > { %v3984_v43 = vpop.f32.mrf.mxu0 }
 0x2d8   : > { %v3985_v49 = vadd.f32 %v3984_v43, %v3983_v40 }
 0x2da   : > { %v2550_v58 = vadd.f32 %v3985_v49, %v2446_v44 }
 0x2dc   : > { %v2660_v61 = vadd.f32 %v4020_v50, %v2550_v58 }
 0x2de   : > { %v2662_v62 = vadd.f32 %v2661_v60, %v2660_v61 }
 0x2e0   : > { %v2663_v63 = vmax.f32 %v2662_v62, 0.0 }
 0x2e2   : > { %4047 = vmatmul.mubr.msk.f32.vlgmr.msra.gmra.mxu0 %vm2673_vm3, %v2663_v63 }
 0x3a2   : > { %v2743_v2 = vpop.f32.mrf.mxu0 }
 0x3a3   : > { %v2744_v3 = vadd.f32 %v2743_v2, %v2672_v1 }
 0x3a4   : > { %v4048_v46 = vpop.f32.mrf.mxu0 }
 0x3a5   : > { %2747 = vst [vmem:[%s270_s14] sm:$0x1] %v2744_v3 }
 0x3a6   : > { %4106 = shalt.err (!%p4103_p3)
}
 0x3a7   : > { %s4107_s23 = scalar_lea.hbm %s6210_s18, 16  ;;  %s4111_s9 = scalar_lea.hbm %s6252_s7, 32 }
 0x3a8   : > { %p4108_p4 = scmp.ne.s32.totalorder %s6210_s18, %s4107_s23  ;;  %p4112_p9 = scmp.lt.s32.totalorder %s6210_s18, %s6252_s7 }
 0x3a9   : > { %p4113_p10 = scmp.lt.s32.totalorder %s4111_s9, %s4107_s23 }
 0x3aa   : > { %p4109_p7 = pnand %p4108_p4, %p4237_p5 }
 0x3ab   : > { %p4114_p11 = por %p4113_p10, %p4112_p9 }
 0x3ac   : > { %p4110_p8 = pneg %p4109_p7 }
 0x3ae   : > { %p4115_p12 = pnand %p4114_p11, %p4110_p8 }
 0x3b0   : > { %4118 = shalt.err (!%p4115_p12)
}
 0x3b1   : > { %4049 = dma.vmem_to_hbm [thread:$0]  (%p4237_p5), %s2762_s15, 16, %s6210_s18, %s2749_s19  }
 0x3b2 PF: > { %p4055_p13 = scmp.ge.s32.totalorder %s4153_s27, 2  ;;  %s2773_s16 = sand.u32 1, %s4141_s24  }
 0x3b3   : > { %s2774_s17 = scalar_lea.sflag [#allocation3], %s2773_s16 }
 0x3b4   : > { %p4052_p0 = pnand %p4055_p13, %p4241_p6 }
 0x3b6   : > { %p4053_p1 = pneg %p4052_p0 }
 0x3b8   : > { %4136 = dma.done.wait (%p4053_p1), %s2774_s17, 16  }
 0x3b9   : > { %4138 = vsyncadd (%p4053_p1), %s2774_s17, 4294967280  ;;  %p17_p2 = scmp.ge.s32.totalorder %s4224_s30, 4   ;;  %s6255_s24 = smov %s4145_s25 }
 0x3ba   : > { %s6256_s25 = smov %s4149_s26  ;;  %s6257_s26 = smov %s4235_s10 }
 0x3bb   : > { %s6258_s27 = smov %s4224_s30  ;;  %19 = sbr.rel (!%p17_p2) target bundleno = 3 (0x3), region = 100 }
 0x3c0   :  { %2778 = vsyncpa [#allocation3], 1 }
 0x3c1   :  { %2780 = vsyncpa [#allocation3 + $0x1], 1 }

</bundles_post_ra>
